<compile_context>
chip_gen: v7x
topology: tpu7x:2x2x1
jax: 0.10.0
libtpu: 0.0.40
codegen_flags: <defaults>
</compile_context>

<pallas_src>
import functools

import jax
import jax.numpy as jnp
from jax.experimental import pallas as pl
from jax.experimental.pallas import tpu as pltpu

HIDDEN = 128  # GCNConv output width (fixed by the module: GCNConv(in_channels, 128))


def _round_up(x, m):
    return (x + m - 1) // m * m


def _mosaic_params(dim_sem, vmem_bytes_est):
    # Explicit VMEM limit: v5e's scoped default is only 16 MiB; clamp to v7x's
    # 64 MiB physical so the same request is valid on every generation.
    limit = int(min(max(vmem_bytes_est + (4 << 20), 32 << 20), 64 << 20))
    return pltpu.CompilerParams(dimension_semantics=dim_sem, vmem_limit_bytes=limit)


# --------------------------------------------------------------------------- #
# Kernel 1a: H = D^{-1/2} (x @ W), emitted in bf16 for the MXU aggregation.
# --------------------------------------------------------------------------- #
def _gcn_lin_kernel(x_ref, w_ref, dinv_ref, h_ref):
    h = jnp.dot(x_ref[...], w_ref[...], preferred_element_type=jnp.float32)
    h_ref[...] = (h * dinv_ref[...]).astype(h_ref.dtype)


def gcn_lin(x_pad, w, dinv_col, tm):
    n_pad, fin = x_pad.shape
    return pl.pallas_call(
        _gcn_lin_kernel,
        out_shape=jax.ShapeDtypeStruct((n_pad, HIDDEN), jnp.bfloat16),
        grid=(n_pad // tm,),
        in_specs=[
            pl.BlockSpec((tm, fin), lambda i: (i, 0)),
            pl.BlockSpec((fin, HIDDEN), lambda i: (0, 0)),
            pl.BlockSpec((tm, 1), lambda i: (i, 0)),
        ],
        out_specs=pl.BlockSpec((tm, HIDDEN), lambda i: (i, 0)),
        compiler_params=pltpu.CompilerParams(dimension_semantics=("parallel",)),
    )(x_pad, w, dinv_col)


# --------------------------------------------------------------------------- #
# Kernel 1b: tiled aggregation  relu( D^{-1/2} (A_hat @ H) + b )  -> bf16
#   grid = (row tiles, contraction tiles); f32 accumulator in VMEM scratch
#   (kept because the output is bf16); H is VMEM-resident when it fits.
# --------------------------------------------------------------------------- #
def _gcn_agg_kernel(a_ref, h_ref, dinv_ref, b_ref, o_ref, acc_ref, *, tk, h_resident):
    k = pl.program_id(1)

    @pl.when(k == 0)
    def _():
        acc_ref[...] = jnp.zeros_like(acc_ref)

    if h_resident:
        # H lives fully in VMEM (DMA'd once); slice the current contraction tile.
        h_blk = h_ref[pl.ds(pl.multiple_of(k * tk, tk), tk), :]
    else:
        h_blk = h_ref[...]
    acc_ref[...] += jnp.dot(a_ref[...], h_blk, preferred_element_type=jnp.float32)

    @pl.when(k == pl.num_programs(1) - 1)
    def _():
        o_ref[...] = jnp.maximum(acc_ref[...] * dinv_ref[...] + b_ref[...],
                                 0.0).astype(o_ref.dtype)


def gcn_agg(a_hat, h_scaled, dinv_col, b, tm, tk):
    n_pad = a_hat.shape[0]
    # Keep H resident when its (double-buffered) footprint is small; else tile it.
    h_resident = (2 * n_pad * HIDDEN * 2) <= (8 << 20)
    if h_resident:
        h_spec = pl.BlockSpec((n_pad, HIDDEN), lambda i, k: (0, 0))
    else:
        h_spec = pl.BlockSpec((tk, HIDDEN), lambda i, k: (k, 0))

    vmem_est = (2 * tm * tk * 2                               # A_hat tiles (bf16, x2)
                + 2 * (n_pad if h_resident else tk) * HIDDEN * 2   # H (bf16)
                + 2 * tm * HIDDEN * 2                         # bf16 output tiles
                + tm * HIDDEN * 4                             # f32 accumulator
                + 2 * tm * 128 * 4 + 2 * 128 * 4)             # dinv / bias (lane pad)

    kernel = functools.partial(_gcn_agg_kernel, tk=tk, h_resident=h_resident)
    return pl.pallas_call(
        kernel,
        out_shape=jax.ShapeDtypeStruct((n_pad, HIDDEN), jnp.bfloat16),
        grid=(n_pad // tm, n_pad // tk),
        in_specs=[
            pl.BlockSpec((tm, tk), lambda i, k: (i, k)),
            h_spec,
            pl.BlockSpec((tm, 1), lambda i, k: (i, 0)),
            pl.BlockSpec((1, HIDDEN), lambda i, k: (0, 0)),
        ],
        out_specs=pl.BlockSpec((tm, HIDDEN), lambda i, k: (i, 0)),
        scratch_shapes=[pltpu.VMEM((tm, HIDDEN), jnp.float32)],
        compiler_params=_mosaic_params(("parallel", "arbitrary"), vmem_est),
    )(a_hat, h_scaled, dinv_col, b)


# --------------------------------------------------------------------------- #
# Kernel 2: DMoNPooling (per graph) + log_softmax over pooled features.
#   grid = (graph, adjacency row tiles).  The adjacency is the only O(nmax^2)
#   tensor; it is row-tiled.  X / mask / degrees / s stay graph-resident.
#   Cluster axis is padded to 128 lanes (padded logits carry bias -1e30 so their
#   softmax prob is exactly 0); the 3 losses pack into one (1, 128) lane-dense store.
# --------------------------------------------------------------------------- #
def _dmon_kernel(x_ref, adj_ref, mask_ref, deg_ref, w_ref, b_ref,
                 s_ref, y_ref, loss_ref,
                 sm_sc, tr_sc, ca_sc, *, num_clusters, t_row):
    k = pl.program_id(1)
    c_pad = w_ref.shape[1]
    C = num_clusters

    @pl.when(k == 0)
    def _():
        X = x_ref[...]            # (nmax, D) bf16; rows outside mask are zero
        m = mask_ref[...]         # (nmax, 1) f32
        deg = deg_ref[...]        # (nmax, 1) f32 (exact out-degrees, zero when masked)

        # s = softmax(Linear(x)); padded cluster lanes have bias -1e30 -> prob 0.
        logits = jnp.dot(X, w_ref[...], preferred_element_type=jnp.float32) + b_ref[...]
        logits = logits - jnp.max(logits, axis=-1, keepdims=True)
        e = jnp.exp(logits)
        s = e * pl.reciprocal(jnp.sum(e, axis=-1, keepdims=True), approx=True)
        sm = s * m                                               # (nmax, c_pad) f32

        s_ref[...] = sm
        sm_b = sm.astype(jnp.bfloat16)
        sm_sc[...] = sm_b                                        # for A @ s tiles

        # pooled node features: selu(s^T x)  (bf16 MXU operands, f32 accumulate)
        dn = (((0,), (0,)), ((), ()))
        pooled = jax.lax.dot_general(sm_b, X, dn, preferred_element_type=jnp.float32)
        alpha = 1.6732632423543772848170429916717
        scale = 1.0507009873554804934193349852946
        out = scale * jnp.where(pooled > 0.0, pooled,
                                alpha * (jnp.exp(jnp.minimum(pooled, 0.0)) - 1.0))
        # log_softmax over the feature axis of the pooled features
        z = out - jnp.max(out, axis=-1, keepdims=True)
        y_ref[...] = z - jnp.log(jnp.sum(jnp.exp(z), axis=-1, keepdims=True))

        # ---- orthogonality loss (exact divides for the scalar normalizers) ----
        ss = jax.lax.dot_general(sm_b, sm_b, dn, preferred_element_type=jnp.float32)
        fro = jnp.sqrt(jnp.sum(ss * ss, keepdims=True))
        r = jax.lax.broadcasted_iota(jnp.int32, (c_pad, c_pad), 0)
        c = jax.lax.broadcasted_iota(jnp.int32, (c_pad, c_pad), 1)
        eye = ((r == c) & (r < C)).astype(jnp.float32)           # I_C, zero-padded
        diff = ss / jnp.maximum(fro, 1e-20) - eye * (float(C) ** -0.5)
        ortho = jnp.sqrt(jnp.sum(diff * diff, keepdims=True))

        # ---- cluster-size loss ----
        csize = jnp.sum(sm, axis=0, keepdims=True)               # (1, c_pad)
        cnorm = jnp.sqrt(jnp.sum(csize * csize, keepdims=True))
        nnodes = jnp.maximum(jnp.sum(m, keepdims=True), 1.0)
        cluster = cnorm / nnodes * (float(C) ** 0.5) - 1.0

        lane = jax.lax.broadcasted_iota(jnp.int32, loss_ref.shape, 1)
        loss_ref[...] = (jnp.where(lane == 1, ortho, 0.0)
                         + jnp.where(lane == 2, cluster, 0.0))

        # cross-tile accumulators for the spectral loss
        ca_sc[...] = jnp.sum(sm * deg, axis=0, keepdims=True)    # (1, c_pad) == s^T d
        tr_sc[...] = jnp.zeros_like(tr_sc)

    # ---- every row tile: trace(s^T A s) contribution from this adjacency slab ----
    row0 = pl.multiple_of(k * t_row, t_row)
    sm_rows = sm_sc[pl.ds(row0, t_row), :]                       # (t_row, c_pad) bf16
    As = jnp.dot(adj_ref[...], sm_sc[...],
                 preferred_element_type=jnp.float32)             # (t_row, c_pad)
    tr_sc[...] += jnp.sum(sm_rows.astype(jnp.float32) * As, axis=0, keepdims=True)

    @pl.when(k == pl.num_programs(1) - 1)
    def _():
        deg = deg_ref[...]
        two_m = jnp.maximum(jnp.sum(deg, keepdims=True), 1e-12)  # (1,1) == 2m
        ca = ca_sc[...]
        tr_out_adj = jnp.sum(tr_sc[...], keepdims=True)
        tr_norm = jnp.sum(ca * ca, keepdims=True) / two_m
        spectral = -(tr_out_adj - tr_norm) / two_m
        lane = jax.lax.broadcasted_iota(jnp.int32, loss_ref.shape, 1)
        loss_ref[...] += jnp.where(lane == 0, spectral, 0.0)


def dmon_pool(x_dense, adj_dense, mask_f, deg_dense, w_pad, b_pad, *,
              num_clusters, t_row):
    B, nmax, d = x_dense.shape
    c_pad = w_pad.shape[1]
    n_tiles = nmax // t_row
    kernel = functools.partial(_dmon_kernel, num_clusters=num_clusters, t_row=t_row)

    vmem_est = (2 * t_row * nmax * 2          # adjacency row tiles (bf16, x2)
                + 2 * nmax * d * 2            # resident X (bf16, x2)
                + 2 * 2 * nmax * 128 * 4      # mask + degrees (lane-padded f32, x2)
                + 2 * nmax * c_pad * 4        # s output (f32, x2)
                + 2 * c_pad * d * 4           # pooled/log_softmax output
                + nmax * c_pad * 2            # sm scratch (bf16)
                + 8 * 128 * 4 * 4)            # small scratches / loss block

    # TODO(synk): if B == 1 on a 2-TensorCore chip (v7x), repartition so a node-tile
    # axis becomes the "parallel" dimension instead of the batch axis.
    return pl.pallas_call(
        kernel,
        out_shape=(
            jax.ShapeDtypeStruct((B, nmax, c_pad), jnp.float32),   # s (masked, lane-padded)
            jax.ShapeDtypeStruct((B, c_pad, d), jnp.float32),      # log_softmax(pooled x)
            jax.ShapeDtypeStruct((B, 1, 128), jnp.float32),        # [spectral, ortho, cluster]
        ),
        grid=(B, n_tiles),
        in_specs=[
            pl.BlockSpec((None, nmax, d), lambda b, k: (b, 0, 0)),
            pl.BlockSpec((None, t_row, nmax), lambda b, k: (b, k, 0)),
            pl.BlockSpec((None, nmax, 1), lambda b, k: (b, 0, 0)),
            pl.BlockSpec((None, nmax, 1), lambda b, k: (b, 0, 0)),
            pl.BlockSpec((d, c_pad), lambda b, k: (0, 0)),
            pl.BlockSpec((1, c_pad), lambda b, k: (0, 0)),
        ],
        out_specs=(
            pl.BlockSpec((None, nmax, c_pad), lambda b, k: (b, 0, 0)),
            pl.BlockSpec((None, c_pad, d), lambda b, k: (b, 0, 0)),
            pl.BlockSpec((None, 1, 128), lambda b, k: (b, 0, 0)),
        ),
        scratch_shapes=[
            pltpu.VMEM((nmax, c_pad), jnp.bfloat16),   # masked s, bf16, for A @ s
            pltpu.VMEM((1, c_pad), jnp.float32),       # trace(s^T A s) accumulator
            pltpu.VMEM((1, c_pad), jnp.float32),       # ca = s^T degrees
        ],
        compiler_params=_mosaic_params(("parallel", "arbitrary"), vmem_est),
    )(x_dense, adj_dense, mask_f, deg_dense, w_pad, b_pad)


# --------------------------------------------------------------------------- #
# Full forward (glue in plain JAX: dense batching, O(E) scatters only)
# --------------------------------------------------------------------------- #
def net_forward(x, edge_index, batch, params, *, num_graphs, max_nodes):
    w1, b1, wm, bm = params
    n, fin = x.shape
    src, dst = edge_index[0], edge_index[1]

    # GCNConv gcn_norm degrees of A_hat = A + I (aggregation at dst): O(E) scatter.
    deg = jnp.ones((n,), jnp.float32).at[dst].add(1.0)
    dinv = jax.lax.rsqrt(deg)   # deg >= 1 thanks to the self loop

    # Tile sizes / zero-padding for the tiled adjacency matmul (bigger tiles now;
    # shrink only when the zero-padding waste would get large).
    if n <= 1024:
        tm = tk = _round_up(n, 128)
    else:
        tm = 1024
        while tm > 256 and _round_up(n, tm) - n > max(n // 8, 256):
            tm //= 2
        tk = tm
    n_pad = _round_up(n, tm)

    # Unnormalized A_hat, stored bf16 in HBM (adjacency matmul is HBM-bound).
    # TODO(synk): on v7x, store A_hat in fp8 (e4m3) for ~2x on the dominant stream;
    # on v5e/v6e the int8 path needs H quantization scales as well.
    # TODO(synk): this dense O(N^2) build is an XLA scatter re-done every call;
    # replace with a CSR / scalar-prefetch gather kernel (or cache across calls).
    idx = jnp.arange(n)
    a_hat = (jnp.zeros((n_pad, n_pad), jnp.bfloat16)
             .at[dst, src].add(1.0)
             .at[idx, idx].add(1.0))
    dinv_col = jnp.zeros((n_pad, 1), jnp.float32).at[:n, 0].set(dinv)
    x_pad = jnp.zeros((n_pad, fin), jnp.float32).at[:n].set(x)

    h_scaled = gcn_lin(x_pad, w1, dinv_col, tm)                  # (n_pad, 128) bf16
    h = gcn_agg(a_hat, h_scaled, dinv_col, b1, tm, tk)[:n]       # (n, 128) bf16, post-ReLU

    # to_dense_batch / to_dense_adj (batch assumed sorted, as PyG requires).
    nmax_p = _round_up(max_nodes, 8)
    if nmax_p <= 1024:
        t_row = nmax_p
    else:
        t_row = 512 if max_nodes <= 4096 else 256
        nmax_p = _round_up(max_nodes, t_row)

    starts = jnp.searchsorted(batch, jnp.arange(num_graphs, dtype=batch.dtype))
    local = idx - starts[batch]
    x_dense = jnp.zeros((num_graphs, nmax_p, HIDDEN), jnp.bfloat16).at[batch, local].set(h)
    mask_f = jnp.zeros((num_graphs, nmax_p, 1), jnp.float32).at[batch, local, 0].set(1.0)
    eb = batch[src]
    src_l = src - starts[eb]
    dst_l = dst - starts[eb]
    adj_dense = jnp.zeros((num_graphs, nmax_p, nmax_p), jnp.bfloat16).at[
        eb, src_l, dst_l].add(1.0)
    # Exact dense-adjacency row sums (out-degrees) via an O(E) scatter: replaces the
    # in-kernel (N,N) f32 cast + XLU row-reduction from the previous revision.
    deg_dense = jnp.zeros((num_graphs, nmax_p, 1), jnp.float32).at[eb, src_l, 0].add(1.0)

    # Lane-dense cluster axis: pad C up to 128; padded logits get bias -1e30 so their
    # softmax probability is exactly 0 and the losses / pooled features are unchanged.
    C = wm.shape[1]
    c_pad = _round_up(max(C, 128), 128)
    wm_pad = jnp.zeros((HIDDEN, c_pad), jnp.bfloat16).at[:, :C].set(wm.astype(jnp.bfloat16))
    bm_pad = jnp.full((1, c_pad), -1e30, jnp.float32).at[:, :C].set(bm)

    s_pad, logp_pad, losses = dmon_pool(x_dense, adj_dense, mask_f, deg_dense,
                                        wm_pad, bm_pad, num_clusters=C, t_row=t_row)
    s = s_pad[:, :max_nodes, :C]
    logp = logp_pad[:, :C, :]
    loss = (losses[:, 0, 0].mean() + losses[:, 0, 1].mean()
            + losses[:, 0, 2].mean())                            # sp1 + o1 + c1
    return logp, loss, s


if __name__ == "__main__":
    in_channels = 16
    out_channels = 8          # number of DMoN clusters
    num_graphs = 2
    nodes_per_graph = 8
    n = num_graphs * nodes_per_graph

    key = jax.random.PRNGKey(0)
    kx, k1, k2, k3, k4 = jax.random.split(key, 5)
    x = jax.random.normal(kx, (n, in_channels), jnp.float32)

    # Deterministic parameter init (GCNConv linear+bias; DMoN MLP linear+bias).
    w1 = jax.random.normal(k1, (in_channels, HIDDEN), jnp.float32) / jnp.sqrt(float(in_channels))
    b1 = jax.random.normal(k2, (1, HIDDEN), jnp.float32) * 0.01
    wm = jax.random.normal(k3, (HIDDEN, out_channels), jnp.float32) / jnp.sqrt(float(HIDDEN))
    bm = jax.random.normal(k4, (1, out_channels), jnp.float32) * 0.01

    # Ring graph inside each batch element, symmetric directed edges.
    edges = []
    for g in range(num_graphs):
        off = g * nodes_per_graph
        for i in range(nodes_per_graph):
            j = (i + 1) % nodes_per_graph
            edges.append((off + i, off + j))
            edges.append((off + j, off + i))
    edge_index = jnp.array(edges, dtype=jnp.int32).T            # (2, E)
    batch = jnp.repeat(jnp.arange(num_graphs, dtype=jnp.int32), nodes_per_graph)

    fwd = jax.jit(functools.partial(net_forward, num_graphs=num_graphs,
                                    max_nodes=nodes_per_graph))
    logp, loss, s = fwd(x, edge_index, batch, (w1, b1, wm, bm))
    jax.block_until_ready((logp, loss, s))

    assert logp.shape == (num_graphs, out_channels, HIDDEN)
    assert s.shape == (num_graphs, nodes_per_graph, out_channels)
    assert loss.shape == ()
    assert bool(jnp.all(jnp.isfinite(logp))) and bool(jnp.isfinite(loss))
    # TODO(synk): DMoN dropout is a no-op at default dropout=0.0 / eval mode, so it is omitted.
    print("KERNEL_OK")
</pallas_src>

<mosaic_0001>
module attributes {stable_mosaic.version = 11 : i64} {
  func.func private @main(%arg0: i32) attributes {dimension_semantics = [#tpu.dimension_semantics<core_parallel>], iteration_bounds = array<i64: 2>, tpu.core_type = #tpu.core_type<sc_scalar_subcore>, window_params = []} {
    return
  }
}

module attributes {stable_mosaic.version = 11 : i64} {
  func.func private @main(%arg0: i32) attributes {dimension_semantics = [#tpu.dimension_semantics<core_parallel>], iteration_bounds = array<i64: 2>, tpu.core_type = #tpu.core_type<sc_scalar_subcore>, window_params = []} {
    return
  }
}

module attributes {stable_mosaic.version = 11 : i64} {
  func.func @_gcn_lin_kernel(%arg0: i32, %arg1: memref<128x16xf32, #tpu.memory_space<vmem>>, %arg2: memref<16x128xf32, #tpu.memory_space<vmem>>, %arg3: memref<128x1xf32, #tpu.memory_space<vmem>>, %arg4: memref<128x128xbf16, #tpu.memory_space<vmem>>) attributes {dimension_semantics = [#tpu.dimension_semantics<parallel>], iteration_bounds = array<i64: 1>, scalar_prefetch = 0 : i64, scratch_operands = 0 : i64, tpu.core_type = #tpu.core_type<tc>, window_params = [{transform_indices = @transform_0, window_bounds = array<i64: 128, 16>}, {pipeline_mode = #tpu.pipeline_mode<synchronous>, transform_indices = @transform_1, window_bounds = array<i64: 16, 128>}, {transform_indices = @transform_2, window_bounds = array<i64: 128, 1>}, {transform_indices = @transform_3, window_bounds = array<i64: 128, 128>}]} {
    %c0 = arith.constant 0 : index
    %c0_0 = arith.constant 0 : index
    %0 = vector.load %arg1[%c0, %c0_0] : memref<128x16xf32, #tpu.memory_space<vmem>>, vector<128x16xf32>
    %c0_1 = arith.constant 0 : index
    %c0_2 = arith.constant 0 : index
    %1 = vector.load %arg2[%c0_1, %c0_2] : memref<16x128xf32, #tpu.memory_space<vmem>>, vector<16x128xf32>
    %cst = arith.constant dense<0.000000e+00> : vector<128x128xf32>
    %2 = tpu.matmul %0, %1, %cst {dimension_numbers = #tpu.dot_dimension_numbers<[1], [0], [0], [1], [0, 0, 1, 1], [], []>} : vector<128x16xf32>, vector<16x128xf32>, vector<128x128xf32> -> vector<128x128xf32>
    %c0_3 = arith.constant 0 : index
    %c0_4 = arith.constant 0 : index
    %3 = vector.load %arg3[%c0_3, %c0_4] : memref<128x1xf32, #tpu.memory_space<vmem>>, vector<128x1xf32>
    %4 = vector.broadcast %3 : vector<128x1xf32> to vector<128x128xf32>
    %5 = arith.mulf %2, %4 : vector<128x128xf32>
    %6 = arith.truncf %5 : vector<128x128xf32> to vector<128x128xbf16>
    %c0_5 = arith.constant 0 : index
    %c0_6 = arith.constant 0 : index
    %7 = vector.load %arg4[%c0_5, %c0_6] : memref<128x128xbf16, #tpu.memory_space<vmem>>, vector<128x128xbf16>
    tpu.vector_store %arg4[%c0_5, %c0_6], %6 {strides = array<i32>} : memref<128x128xbf16, #tpu.memory_space<vmem>>, vector<128x128xbf16>,
    return
  }
  func.func @transform_0(%arg0: i32) -> (i32, i32) {
    %c0_i32 = arith.constant 0 : i32
    %c0_i32_0 = arith.constant 0 : i32
    return %arg0, %c0_i32 : i32, i32
  }
  func.func @transform_1(%arg0: i32) -> (i32, i32) {
    %c0_i32 = arith.constant 0 : i32
    %c0_i32_0 = arith.constant 0 : i32
    %c0_i32_1 = arith.constant 0 : i32
    return %c0_i32, %c0_i32_0 : i32, i32
  }
  func.func @transform_2(%arg0: i32) -> (i32, i32) {
    %c0_i32 = arith.constant 0 : i32
    %c0_i32_0 = arith.constant 0 : i32
    return %arg0, %c0_i32 : i32, i32
  }
  func.func @transform_3(%arg0: i32) -> (i32, i32) {
    %c0_i32 = arith.constant 0 : i32
    %c0_i32_0 = arith.constant 0 : i32
    return %arg0, %c0_i32 : i32, i32
  }
}

module attributes {stable_mosaic.version = 11 : i64} {
  func.func @_gcn_agg_kernel(%arg0: i32, %arg1: i32, %arg2: memref<128x128xbf16, #tpu.memory_space<vmem>>, %arg3: memref<128x128xbf16, #tpu.memory_space<vmem>>, %arg4: memref<128x1xf32, #tpu.memory_space<vmem>>, %arg5: memref<1x128xf32, #tpu.memory_space<vmem>>, %arg6: memref<128x128xbf16, #tpu.memory_space<vmem>>, %arg7: memref<128x128xf32, #tpu.memory_space<vmem>>) attributes {dimension_semantics = [#tpu.dimension_semantics<parallel>, #tpu.dimension_semantics<arbitrary>], iteration_bounds = array<i64: 1, 1>, scalar_prefetch = 0 : i64, scratch_operands = 1 : i64, tpu.core_type = #tpu.core_type<tc>, window_params = [{transform_indices = @transform_0, window_bounds = array<i64: 128, 128>}, {pipeline_mode = #tpu.pipeline_mode<synchronous>, transform_indices = @transform_1, window_bounds = array<i64: 128, 128>}, {transform_indices = @transform_2, window_bounds = array<i64: 128, 1>}, {pipeline_mode = #tpu.pipeline_mode<synchronous>, transform_indices = @transform_3, window_bounds = array<i64: 1, 128>}, {transform_indices = @transform_4, window_bounds = array<i64: 128, 128>}]} {
    %c0_i32 = arith.constant 0 : i32
    %0 = arith.cmpi eq, %arg1, %c0_i32 : i32
    %1 = arith.extui %0 : i1 to i32
    %c0_i32_0 = arith.constant 0 : i32
    %2 = arith.cmpi ne, %1, %c0_i32_0 : i32
    scf.if %2 {
      %cst_9 = arith.constant 0.000000e+00 : f32
      %15 = vector.broadcast %cst_9 : f32 to vector<128x128xf32>
      %c0_10 = arith.constant 0 : index
      %c0_11 = arith.constant 0 : index
      %16 = vector.load %arg7[%c0_10, %c0_11] : memref<128x128xf32, #tpu.memory_space<vmem>>, vector<128x128xf32>
      tpu.vector_store %arg7[%c0_10, %c0_11], %15 {strides = array<i32>} : memref<128x128xf32, #tpu.memory_space<vmem>>, vector<128x128xf32>,
    } else {
    }
    %c128_i32 = arith.constant 128 : i32
    %3 = arith.muli %arg1, %c128_i32 : i32
    %4 = tpu.assume_multiple %3, 128 : i32
    %5 = arith.index_cast %4 : i32 to index
    %c0 = arith.constant 0 : index
    %6 = vector.load %arg3[%5, %c0] : memref<128x128xbf16, #tpu.memory_space<vmem>>, vector<128x128xbf16>
    %c0_1 = arith.constant 0 : index
    %c0_2 = arith.constant 0 : index
    %7 = vector.load %arg7[%c0_1, %c0_2] : memref<128x128xf32, #tpu.memory_space<vmem>>, vector<128x128xf32>
    %c0_3 = arith.constant 0 : index
    %c0_4 = arith.constant 0 : index
    %8 = vector.load %arg2[%c0_3, %c0_4] : memref<128x128xbf16, #tpu.memory_space<vmem>>, vector<128x128xbf16>
    %cst = arith.constant dense<0.000000e+00> : vector<128x128xf32>
    %9 = tpu.matmul %8, %6, %cst {dimension_numbers = #tpu.dot_dimension_numbers<[1], [0], [0], [1], [0, 0, 1, 1], [], []>} : vector<128x128xbf16>, vector<128x128xbf16>, vector<128x128xf32> -> vector<128x128xf32>
    %10 = arith.addf %7, %9 : vector<128x128xf32>
    %c0_5 = arith.constant 0 : index
    %c0_6 = arith.constant 0 : index
    %11 = vector.load %arg7[%c0_5, %c0_6] : memref<128x128xf32, #tpu.memory_space<vmem>>, vector<128x128xf32>
    tpu.vector_store %arg7[%c0_5, %c0_6], %10 {strides = array<i32>} : memref<128x128xf32, #tpu.memory_space<vmem>>, vector<128x128xf32>,
    %c0_i32_7 = arith.constant 0 : i32
    %12 = arith.cmpi eq, %arg1, %c0_i32_7 : i32
    %13 = arith.extui %12 : i1 to i32
    %c0_i32_8 = arith.constant 0 : i32
    %14 = arith.cmpi ne, %13, %c0_i32_8 : i32
    scf.if %14 {
      %c0_9 = arith.constant 0 : index
      %c0_10 = arith.constant 0 : index
      %15 = vector.load %arg7[%c0_9, %c0_10] : memref<128x128xf32, #tpu.memory_space<vmem>>, vector<128x128xf32>
      %c0_11 = arith.constant 0 : index
      %c0_12 = arith.constant 0 : index
      %16 = vector.load %arg4[%c0_11, %c0_12] : memref<128x1xf32, #tpu.memory_space<vmem>>, vector<128x1xf32>
      %17 = vector.broadcast %16 : vector<128x1xf32> to vector<128x128xf32>
      %18 = arith.mulf %15, %17 : vector<128x128xf32>
      %c0_13 = arith.constant 0 : index
      %c0_14 = arith.constant 0 : index
      %19 = vector.load %arg5[%c0_13, %c0_14] : memref<1x128xf32, #tpu.memory_space<vmem>>, vector<1x128xf32>
      %20 = vector.broadcast %19 : vector<1x128xf32> to vector<128x128xf32>
      %21 = arith.addf %18, %20 : vector<128x128xf32>
      %cst_15 = arith.constant 0.000000e+00 : f32
      %22 = vector.broadcast %cst_15 : f32 to vector<128x128xf32>
      %23 = arith.maximumf %21, %22 : vector<128x128xf32>
      %24 = arith.truncf %23 : vector<128x128xf32> to vector<128x128xbf16>
      %c0_16 = arith.constant 0 : index
      %c0_17 = arith.constant 0 : index
      %25 = vector.load %arg6[%c0_16, %c0_17] : memref<128x128xbf16, #tpu.memory_space<vmem>>, vector<128x128xbf16>
      tpu.vector_store %arg6[%c0_16, %c0_17], %24 {strides = array<i32>} : memref<128x128xbf16, #tpu.memory_space<vmem>>, vector<128x128xbf16>,
    } else {
    }
    return
  }
  func.func @transform_0(%arg0: i32, %arg1: i32) -> (i32, i32) {
    %c0_i32 = arith.constant 0 : i32
    return %arg0, %arg1 : i32, i32
  }
  func.func @transform_1(%arg0: i32, %arg1: i32) -> (i32, i32) {
    %c0_i32 = arith.constant 0 : i32
    %c0_i32_0 = arith.constant 0 : i32
    %c0_i32_1 = arith.constant 0 : i32
    return %c0_i32, %c0_i32_0 : i32, i32
  }
  func.func @transform_2(%arg0: i32, %arg1: i32) -> (i32, i32) {
    %c0_i32 = arith.constant 0 : i32
    %c0_i32_0 = arith.constant 0 : i32
    return %arg0, %c0_i32 : i32, i32
  }
  func.func @transform_3(%arg0: i32, %arg1: i32) -> (i32, i32) {
    %c0_i32 = arith.constant 0 : i32
    %c0_i32_0 = arith.constant 0 : i32
    %c0_i32_1 = arith.constant 0 : i32
    return %c0_i32, %c0_i32_0 : i32, i32
  }
  func.func @transform_4(%arg0: i32, %arg1: i32) -> (i32, i32) {
    %c0_i32 = arith.constant 0 : i32
    %c0_i32_0 = arith.constant 0 : i32
    return %arg0, %c0_i32 : i32, i32
  }
}

module attributes {stable_mosaic.version = 11 : i64} {
  func.func @_dmon_kernel(%arg0: i32, %arg1: i32, %arg2: memref<1x8x128xbf16, #tpu.memory_space<vmem>>, %arg3: memref<1x8x8xbf16, #tpu.memory_space<vmem>>, %arg4: memref<1x8x1xf32, #tpu.memory_space<vmem>>, %arg5: memref<1x8x1xf32, #tpu.memory_space<vmem>>, %arg6: memref<128x128xbf16, #tpu.memory_space<vmem>>, %arg7: memref<1x128xf32, #tpu.memory_space<vmem>>, %arg8: memref<1x8x128xf32, #tpu.memory_space<vmem>>, %arg9: memref<1x128x128xf32, #tpu.memory_space<vmem>>, %arg10: memref<1x1x128xf32, #tpu.memory_space<vmem>>, %arg11: memref<8x128xbf16, #tpu.memory_space<vmem>>, %arg12: memref<1x128xf32, #tpu.memory_space<vmem>>, %arg13: memref<1x128xf32, #tpu.memory_space<vmem>>) attributes {dimension_semantics = [#tpu.dimension_semantics<parallel>, #tpu.dimension_semantics<arbitrary>], iteration_bounds = array<i64: 2, 1>, scalar_prefetch = 0 : i64, scratch_operands = 3 : i64, tpu.core_type = #tpu.core_type<tc>, window_params = [{transform_indices = @transform_0, window_bounds = array<i64: 1, 8, 128>}, {transform_indices = @transform_1, window_bounds = array<i64: 1, 8, 8>}, {transform_indices = @transform_2, window_bounds = array<i64: 1, 8, 1>}, {transform_indices = @transform_3, window_bounds = array<i64: 1, 8, 1>}, {pipeline_mode = #tpu.pipeline_mode<synchronous>, transform_indices = @transform_4, window_bounds = array<i64: 128, 128>}, {pipeline_mode = #tpu.pipeline_mode<synchronous>, transform_indices = @transform_5, window_bounds = array<i64: 1, 128>}, {transform_indices = @transform_6, window_bounds = array<i64: 1, 8, 128>}, {transform_indices = @transform_7, window_bounds = array<i64: 1, 128, 128>}, {transform_indices = @transform_8, window_bounds = array<i64: 1, 1, 128>}]} {
    %c0_i32 = arith.constant 0 : i32
    %0 = arith.cmpi eq, %arg1, %c0_i32 : i32
    %1 = arith.extui %0 : i1 to i32
    %c0_i32_0 = arith.constant 0 : i32
    %2 = arith.cmpi ne, %1, %c0_i32_0 : i32
    scf.if %2 {
      %c0_13 = arith.constant 0 : index
      %c0_14 = arith.constant 0 : index
      %c0_15 = arith.constant 0 : index
      %21 = vector.load %arg2[%c0_13, %c0_14, %c0_15] : memref<1x8x128xbf16, #tpu.memory_space<vmem>>, vector<1x8x128xbf16>
      %22 = vector.shape_cast %21 : vector<1x8x128xbf16> to vector<8x128xbf16>
      %c0_16 = arith.constant 0 : index
      %c0_17 = arith.constant 0 : index
      %c0_18 = arith.constant 0 : index
      %23 = vector.load %arg4[%c0_16, %c0_17, %c0_18] : memref<1x8x1xf32, #tpu.memory_space<vmem>>, vector<1x8x1xf32>
      %24 = vector.shape_cast %23 : vector<1x8x1xf32> to vector<8x1xf32>
      %c0_19 = arith.constant 0 : index
      %c0_20 = arith.constant 0 : index
      %c0_21 = arith.constant 0 : index
      %25 = vector.load %arg5[%c0_19, %c0_20, %c0_21] : memref<1x8x1xf32, #tpu.memory_space<vmem>>, vector<1x8x1xf32>
      %26 = vector.shape_cast %25 : vector<1x8x1xf32> to vector<8x1xf32>
      %c0_22 = arith.constant 0 : index
      %c0_23 = arith.constant 0 : index
      %27 = vector.load %arg6[%c0_22, %c0_23] : memref<128x128xbf16, #tpu.memory_space<vmem>>, vector<128x128xbf16>
      %cst_24 = arith.constant dense<0.000000e+00> : vector<8x128xf32>
      %28 = tpu.matmul %22, %27, %cst_24 {dimension_numbers = #tpu.dot_dimension_numbers<[1], [0], [0], [1], [0, 0, 1, 1], [], []>} : vector<8x128xbf16>, vector<128x128xbf16>, vector<8x128xf32> -> vector<8x128xf32>
      %c0_25 = arith.constant 0 : index
      %c0_26 = arith.constant 0 : index
      %29 = vector.load %arg7[%c0_25, %c0_26] : memref<1x128xf32, #tpu.memory_space<vmem>>, vector<1x128xf32>
      %30 = vector.broadcast %29 : vector<1x128xf32> to vector<8x128xf32>
      %31 = arith.addf %28, %30 : vector<8x128xf32>
      %cst_27 = arith.constant dense<0xFF800000> : vector<8xf32>
      %32 = vector.multi_reduction <maximumf>, %31, %cst_27 [1] : vector<8x128xf32> to vector<8xf32>
      %33 = vector.shape_cast %32 : vector<8xf32> to vector<8x1xf32>
      %34 = vector.broadcast %33 : vector<8x1xf32> to vector<8x128xf32>
      %35 = arith.subf %31, %34 : vector<8x128xf32>
      %36 = math.exp %35 : vector<8x128xf32>
      %cst_28 = arith.constant dense<0.000000e+00> : vector<8xf32>
      %37 = vector.multi_reduction <add>, %36, %cst_28 [1] : vector<8x128xf32> to vector<8xf32>
      %38 = vector.shape_cast %37 : vector<8xf32> to vector<8x1xf32>
      %39 = tpu.reciprocal %38 {approx = true} : vector<8x1xf32> -> vector<8x1xf32>
      %40 = vector.broadcast %39 : vector<8x1xf32> to vector<8x128xf32>
      %41 = arith.mulf %36, %40 : vector<8x128xf32>
      %42 = vector.broadcast %24 : vector<8x1xf32> to vector<8x128xf32>
      %43 = arith.mulf %41, %42 : vector<8x128xf32>
      %c0_29 = arith.constant 0 : index
      %c0_30 = arith.constant 0 : index
      %c0_31 = arith.constant 0 : index
      %44 = vector.load %arg8[%c0_29, %c0_30, %c0_31] : memref<1x8x128xf32, #tpu.memory_space<vmem>>, vector<1x8x128xf32>
      %45 = vector.shape_cast %44 : vector<1x8x128xf32> to vector<8x128xf32>
      %46 = vector.shape_cast %43 : vector<8x128xf32> to vector<1x8x128xf32>
      tpu.vector_store %arg8[%c0_29, %c0_30, %c0_31], %46 {strides = array<i32>} : memref<1x8x128xf32, #tpu.memory_space<vmem>>, vector<1x8x128xf32>,
      %47 = arith.truncf %43 : vector<8x128xf32> to vector<8x128xbf16>
      %c0_32 = arith.constant 0 : index
      %c0_33 = arith.constant 0 : index
      %48 = vector.load %arg11[%c0_32, %c0_33] : memref<8x128xbf16, #tpu.memory_space<vmem>>, vector<8x128xbf16>
      tpu.vector_store %arg11[%c0_32, %c0_33], %47 {strides = array<i32>} : memref<8x128xbf16, #tpu.memory_space<vmem>>, vector<8x128xbf16>,
      %cst_34 = arith.constant dense<0.000000e+00> : vector<128x128xf32>
      %49 = tpu.matmul %47, %22, %cst_34 {dimension_numbers = #tpu.dot_dimension_numbers<[0], [0], [1], [1], [0, 1, 1, 1], [], []>} : vector<8x128xbf16>, vector<8x128xbf16>, vector<128x128xf32> -> vector<128x128xf32>
      %cst_35 = arith.constant 0.000000e+00 : f32
      %50 = vector.broadcast %cst_35 : f32 to vector<128x128xf32>
      %51 = arith.cmpf ogt, %49, %50 : vector<128x128xf32>
      %cst_36 = arith.constant 0.000000e+00 : f32
      %52 = vector.broadcast %cst_36 : f32 to vector<128x128xf32>
      %53 = arith.minimumf %49, %52 : vector<128x128xf32>
      %54 = math.exp %53 : vector<128x128xf32>
      %cst_37 = arith.constant 1.000000e+00 : f32
      %55 = vector.broadcast %cst_37 : f32 to vector<128x128xf32>
      %56 = arith.subf %54, %55 : vector<128x128xf32>
      %cst_38 = arith.constant 1.67326319 : f32
      %57 = vector.broadcast %cst_38 : f32 to vector<128x128xf32>
      %58 = arith.mulf %57, %56 : vector<128x128xf32>
      %59 = arith.select %51, %49, %58 : vector<128x128xi1>, vector<128x128xf32>
      %cst_39 = arith.constant 1.05070102 : f32
      %60 = vector.broadcast %cst_39 : f32 to vector<128x128xf32>
      %61 = arith.mulf %60, %59 : vector<128x128xf32>
      %cst_40 = arith.constant dense<0xFF800000> : vector<128xf32>
      %62 = vector.multi_reduction <maximumf>, %61, %cst_40 [1] : vector<128x128xf32> to vector<128xf32>
      %63 = vector.shape_cast %62 : vector<128xf32> to vector<128x1xf32>
      %64 = vector.broadcast %63 : vector<128x1xf32> to vector<128x128xf32>
      %65 = arith.subf %61, %64 : vector<128x128xf32>
      %66 = math.exp %65 : vector<128x128xf32>
      %cst_41 = arith.constant dense<0.000000e+00> : vector<128xf32>
      %67 = vector.multi_reduction <add>, %66, %cst_41 [1] : vector<128x128xf32> to vector<128xf32>
      %68 = vector.shape_cast %67 : vector<128xf32> to vector<128x1xf32>
      %69 = math.log %68 : vector<128x1xf32>
      %70 = vector.broadcast %69 : vector<128x1xf32> to vector<128x128xf32>
      %71 = arith.subf %65, %70 : vector<128x128xf32>
      %c0_42 = arith.constant 0 : index
      %c0_43 = arith.constant 0 : index
      %c0_44 = arith.constant 0 : index
      %72 = vector.load %arg9[%c0_42, %c0_43, %c0_44] : memref<1x128x128xf32, #tpu.memory_space<vmem>>, vector<1x128x128xf32>
      %73 = vector.shape_cast %72 : vector<1x128x128xf32> to vector<128x128xf32>
      %74 = vector.shape_cast %71 : vector<128x128xf32> to vector<1x128x128xf32>
      tpu.vector_store %arg9[%c0_42, %c0_43, %c0_44], %74 {strides = array<i32>} : memref<1x128x128xf32, #tpu.memory_space<vmem>>, vector<1x128x128xf32>,
      %cst_45 = arith.constant dense<0.000000e+00> : vector<128x128xf32>
      %75 = tpu.matmul %47, %47, %cst_45 {dimension_numbers = #tpu.dot_dimension_numbers<[0], [0], [1], [1], [0, 1, 1, 1], [], []>} : vector<8x128xbf16>, vector<8x128xbf16>, vector<128x128xf32> -> vector<128x128xf32>
      %76 = arith.mulf %75, %75 : vector<128x128xf32>
      %77 = vector.shape_cast %76 : vector<128x128xf32> to vector<1x128x128xf32>
      %cst_46 = arith.constant dense<0.000000e+00> : vector<1xf32>
      %78 = vector.multi_reduction <add>, %77, %cst_46 [1, 2] : vector<1x128x128xf32> to vector<1xf32>
      %79 = vector.shape_cast %78 : vector<1xf32> to vector<1x1x1xf32>
      %80 = vector.extract %79[0, 0, 0] : f32 from vector<1x1x1xf32>
      %81 = vector.broadcast %80 : f32 to vector<1x1xf32>
      %82 = math.sqrt %81 : vector<1x1xf32>
      %83 = tpu.iota {dimensions = array<i32: 0>} : vector<128x128xi32>
      %84 = tpu.iota {dimensions = array<i32: 1>} : vector<128x128xi32>
      %85 = arith.cmpi eq, %83, %84 : vector<128x128xi32>
      %c8_i32_47 = arith.constant 8 : i32
      %86 = vector.broadcast %c8_i32_47 : i32 to vector<128x128xi32>
      %87 = arith.cmpi slt, %83, %86 : vector<128x128xi32>
      %88 = arith.andi %85, %87 : vector<128x128xi1>
      %89 = arith.extui %88 : vector<128x128xi1> to vector<128x128xi32>
      %90 = arith.sitofp %89 : vector<128x128xi32> to vector<128x128xf32>
      %cst_48 = arith.constant 9.99999968E-21 : f32
      %91 = vector.broadcast %cst_48 : f32 to vector<1x1xf32>
      %92 = arith.maximumf %82, %91 : vector<1x1xf32>
      %93 = vector.broadcast %92 : vector<1x1xf32> to vector<128x128xf32>
      %94 = arith.divf %75, %93 : vector<128x128xf32>
      %cst_49 = arith.constant 0.353553385 : f32
      %95 = vector.broadcast %cst_49 : f32 to vector<128x128xf32>
      %96 = arith.mulf %90, %95 : vector<128x128xf32>
      %97 = arith.subf %94, %96 : vector<128x128xf32>
      %98 = arith.mulf %97, %97 : vector<128x128xf32>
      %99 = vector.shape_cast %98 : vector<128x128xf32> to vector<1x128x128xf32>
      %cst_50 = arith.constant dense<0.000000e+00> : vector<1xf32>
      %100 = vector.multi_reduction <add>, %99, %cst_50 [1, 2] : vector<1x128x128xf32> to vector<1xf32>
      %101 = vector.shape_cast %100 : vector<1xf32> to vector<1x1x1xf32>
      %102 = vector.extract %101[0, 0, 0] : f32 from vector<1x1x1xf32>
      %103 = vector.broadcast %102 : f32 to vector<1x1xf32>
      %104 = math.sqrt %103 : vector<1x1xf32>
      %cst_51 = arith.constant dense<0.000000e+00> : vector<128xf32>
      %105 = vector.multi_reduction <add>, %43, %cst_51 [0] : vector<8x128xf32> to vector<128xf32>
      %106 = vector.shape_cast %105 : vector<128xf32> to vector<1x128xf32>
      %107 = arith.mulf %106, %106 : vector<1x128xf32>
      %108 = vector.shape_cast %107 : vector<1x128xf32> to vector<1x1x128xf32>
      %cst_52 = arith.constant dense<0.000000e+00> : vector<1xf32>
      %109 = vector.multi_reduction <add>, %108, %cst_52 [1, 2] : vector<1x1x128xf32> to vector<1xf32>
      %110 = vector.shape_cast %109 : vector<1xf32> to vector<1x1x1xf32>
      %111 = vector.extract %110[0, 0, 0] : f32 from vector<1x1x1xf32>
      %112 = vector.broadcast %111 : f32 to vector<1x1xf32>
      %113 = math.sqrt %112 : vector<1x1xf32>
      %114 = vector.shape_cast %24 : vector<8x1xf32> to vector<1x8x1xf32>
      %cst_53 = arith.constant dense<0.000000e+00> : vector<1xf32>
      %115 = vector.multi_reduction <add>, %114, %cst_53 [1, 2] : vector<1x8x1xf32> to vector<1xf32>
      %116 = vector.shape_cast %115 : vector<1xf32> to vector<1x1x1xf32>
      %117 = vector.extract %116[0, 0, 0] : f32 from vector<1x1x1xf32>
      %118 = vector.broadcast %117 : f32 to vector<1x1xf32>
      %cst_54 = arith.constant 1.000000e+00 : f32
      %119 = vector.broadcast %cst_54 : f32 to vector<1x1xf32>
      %120 = arith.maximumf %118, %119 : vector<1x1xf32>
      %121 = arith.divf %113, %120 : vector<1x1xf32>
      %cst_55 = arith.constant 2.82842708 : f32
      %122 = vector.broadcast %cst_55 : f32 to vector<1x1xf32>
      %123 = arith.mulf %121, %122 : vector<1x1xf32>
      %cst_56 = arith.constant 1.000000e+00 : f32
      %124 = vector.broadcast %cst_56 : f32 to vector<1x1xf32>
      %125 = arith.subf %123, %124 : vector<1x1xf32>
      %126 = tpu.iota {dimensions = array<i32: 1>} : vector<1x128xi32>
      %c1_i32 = arith.constant 1 : i32
      %127 = vector.broadcast %c1_i32 : i32 to vector<1x128xi32>
      %128 = arith.cmpi eq, %126, %127 : vector<1x128xi32>
      %cst_57 = arith.constant 0.000000e+00 : f32
      %129 = vector.shape_cast %104 : vector<1x1xf32> to vector<1x1xf32>
      %130 = vector.broadcast %129 : vector<1x1xf32> to vector<1x128xf32>
      %131 = vector.broadcast %cst_57 : f32 to vector<1x128xf32>
      %132 = arith.select %128, %130, %131 : vector<1x128xi1>, vector<1x128xf32>
      %c2_i32 = arith.constant 2 : i32
      %133 = vector.broadcast %c2_i32 : i32 to vector<1x128xi32>
      %134 = arith.cmpi eq, %126, %133 : vector<1x128xi32>
      %cst_58 = arith.constant 0.000000e+00 : f32
      %135 = vector.shape_cast %125 : vector<1x1xf32> to vector<1x1xf32>
      %136 = vector.broadcast %135 : vector<1x1xf32> to vector<1x128xf32>
      %137 = vector.broadcast %cst_58 : f32 to vector<1x128xf32>
      %138 = arith.select %134, %136, %137 : vector<1x128xi1>, vector<1x128xf32>
      %139 = arith.addf %132, %138 : vector<1x128xf32>
      %c0_59 = arith.constant 0 : index
      %c0_60 = arith.constant 0 : index
      %c0_61 = arith.constant 0 : index
      %140 = vector.load %arg10[%c0_59, %c0_60, %c0_61] : memref<1x1x128xf32, #tpu.memory_space<vmem>>, vector<1x1x128xf32>
      %141 = vector.shape_cast %140 : vector<1x1x128xf32> to vector<1x128xf32>
      %142 = vector.shape_cast %139 : vector<1x128xf32> to vector<1x1x128xf32>
      tpu.vector_store %arg10[%c0_59, %c0_60, %c0_61], %142 {strides = array<i32>} : memref<1x1x128xf32, #tpu.memory_space<vmem>>, vector<1x1x128xf32>,
      %143 = vector.broadcast %26 : vector<8x1xf32> to vector<8x128xf32>
      %144 = arith.mulf %43, %143 : vector<8x128xf32>
      %cst_62 = arith.constant dense<0.000000e+00> : vector<128xf32>
      %145 = vector.multi_reduction <add>, %144, %cst_62 [0] : vector<8x128xf32> to vector<128xf32>
      %146 = vector.shape_cast %145 : vector<128xf32> to vector<1x128xf32>
      %c0_63 = arith.constant 0 : index
      %c0_64 = arith.constant 0 : index
      %147 = vector.load %arg13[%c0_63, %c0_64] : memref<1x128xf32, #tpu.memory_space<vmem>>, vector<1x128xf32>
      tpu.vector_store %arg13[%c0_63, %c0_64], %146 {strides = array<i32>} : memref<1x128xf32, #tpu.memory_space<vmem>>, vector<1x128xf32>,
      %cst_65 = arith.constant 0.000000e+00 : f32
      %148 = vector.broadcast %cst_65 : f32 to vector<1x128xf32>
      %c0_66 = arith.constant 0 : index
      %c0_67 = arith.constant 0 : index
      %149 = vector.load %arg12[%c0_66, %c0_67] : memref<1x128xf32, #tpu.memory_space<vmem>>, vector<1x128xf32>
      tpu.vector_store %arg12[%c0_66, %c0_67], %148 {strides = array<i32>} : memref<1x128xf32, #tpu.memory_space<vmem>>, vector<1x128xf32>,
    } else {
    }
    %c8_i32 = arith.constant 8 : i32
    %3 = arith.muli %arg1, %c8_i32 : i32
    %4 = tpu.assume_multiple %3, 8 : i32
    %5 = arith.index_cast %4 : i32 to index
    %c0 = arith.constant 0 : index
    %6 = vector.load %arg11[%5, %c0] : memref<8x128xbf16, #tpu.memory_space<vmem>>, vector<8x128xbf16>
    %c0_1 = arith.constant 0 : index
    %c0_2 = arith.constant 0 : index
    %c0_3 = arith.constant 0 : index
    %7 = vector.load %arg3[%c0_1, %c0_2, %c0_3] : memref<1x8x8xbf16, #tpu.memory_space<vmem>>, vector<1x8x8xbf16>
    %8 = vector.shape_cast %7 : vector<1x8x8xbf16> to vector<8x8xbf16>
    %c0_4 = arith.constant 0 : index
    %c0_5 = arith.constant 0 : index
    %9 = vector.load %arg11[%c0_4, %c0_5] : memref<8x128xbf16, #tpu.memory_space<vmem>>, vector<8x128xbf16>
    %cst = arith.constant dense<0.000000e+00> : vector<8x128xf32>
    %10 = tpu.matmul %8, %9, %cst {dimension_numbers = #tpu.dot_dimension_numbers<[1], [0], [0], [1], [0, 0, 1, 1], [], []>} : vector<8x8xbf16>, vector<8x128xbf16>, vector<8x128xf32> -> vector<8x128xf32>
    %c0_6 = arith.constant 0 : index
    %c0_7 = arith.constant 0 : index
    %11 = vector.load %arg12[%c0_6, %c0_7] : memref<1x128xf32, #tpu.memory_space<vmem>>, vector<1x128xf32>
    %12 = arith.extf %6 : vector<8x128xbf16> to vector<8x128xf32>
    %13 = arith.mulf %12, %10 : vector<8x128xf32>
    %cst_8 = arith.constant dense<0.000000e+00> : vector<128xf32>
    %14 = vector.multi_reduction <add>, %13, %cst_8 [0] : vector<8x128xf32> to vector<128xf32>
    %15 = vector.shape_cast %14 : vector<128xf32> to vector<1x128xf32>
    %16 = arith.addf %11, %15 : vector<1x128xf32>
    %c0_9 = arith.constant 0 : index
    %c0_10 = arith.constant 0 : index
    %17 = vector.load %arg12[%c0_9, %c0_10] : memref<1x128xf32, #tpu.memory_space<vmem>>, vector<1x128xf32>
    tpu.vector_store %arg12[%c0_9, %c0_10], %16 {strides = array<i32>} : memref<1x128xf32, #tpu.memory_space<vmem>>, vector<1x128xf32>,
    %c0_i32_11 = arith.constant 0 : i32
    %18 = arith.cmpi eq, %arg1, %c0_i32_11 : i32
    %19 = arith.extui %18 : i1 to i32
    %c0_i32_12 = arith.constant 0 : i32
    %20 = arith.cmpi ne, %19, %c0_i32_12 : i32
    scf.if %20 {
      %c0_13 = arith.constant 0 : index
      %c0_14 = arith.constant 0 : index
      %c0_15 = arith.constant 0 : index
      %21 = vector.load %arg5[%c0_13, %c0_14, %c0_15] : memref<1x8x1xf32, #tpu.memory_space<vmem>>, vector<1x8x1xf32>
      %22 = vector.shape_cast %21 : vector<1x8x1xf32> to vector<8x1xf32>
      %23 = vector.shape_cast %22 : vector<8x1xf32> to vector<1x8x1xf32>
      %cst_16 = arith.constant dense<0.000000e+00> : vector<1xf32>
      %24 = vector.multi_reduction <add>, %23, %cst_16 [1, 2] : vector<1x8x1xf32> to vector<1xf32>
      %25 = vector.shape_cast %24 : vector<1xf32> to vector<1x1x1xf32>
      %26 = vector.extract %25[0, 0, 0] : f32 from vector<1x1x1xf32>
      %27 = vector.broadcast %26 : f32 to vector<1x1xf32>
      %cst_17 = arith.constant 9.99999996E-13 : f32
      %28 = vector.broadcast %cst_17 : f32 to vector<1x1xf32>
      %29 = arith.maximumf %27, %28 : vector<1x1xf32>
      %c0_18 = arith.constant 0 : index
      %c0_19 = arith.constant 0 : index
      %30 = vector.load %arg13[%c0_18, %c0_19] : memref<1x128xf32, #tpu.memory_space<vmem>>, vector<1x128xf32>
      %c0_20 = arith.constant 0 : index
      %c0_21 = arith.constant 0 : index
      %31 = vector.load %arg12[%c0_20, %c0_21] : memref<1x128xf32, #tpu.memory_space<vmem>>, vector<1x128xf32>
      %32 = vector.shape_cast %31 : vector<1x128xf32> to vector<1x1x128xf32>
      %cst_22 = arith.constant dense<0.000000e+00> : vector<1xf32>
      %33 = vector.multi_reduction <add>, %32, %cst_22 [1, 2] : vector<1x1x128xf32> to vector<1xf32>
      %34 = vector.shape_cast %33 : vector<1xf32> to vector<1x1x1xf32>
      %35 = vector.extract %34[0, 0, 0] : f32 from vector<1x1x1xf32>
      %36 = vector.broadcast %35 : f32 to vector<1x1xf32>
      %37 = arith.mulf %30, %30 : vector<1x128xf32>
      %38 = vector.shape_cast %37 : vector<1x128xf32> to vector<1x1x128xf32>
      %cst_23 = arith.constant dense<0.000000e+00> : vector<1xf32>
      %39 = vector.multi_reduction <add>, %38, %cst_23 [1, 2] : vector<1x1x128xf32> to vector<1xf32>
      %40 = vector.shape_cast %39 : vector<1xf32> to vector<1x1x1xf32>
      %41 = vector.extract %40[0, 0, 0] : f32 from vector<1x1x1xf32>
      %42 = vector.broadcast %41 : f32 to vector<1x1xf32>
      %43 = arith.divf %42, %29 : vector<1x1xf32>
      %44 = arith.subf %36, %43 : vector<1x1xf32>
      %cst_24 = arith.constant 0.000000e+00 : f32
      %45 = vector.broadcast %cst_24 : f32 to vector<1x1xf32>
      %46 = arith.subf %45, %44 : vector<1x1xf32>
      %47 = arith.divf %46, %29 : vector<1x1xf32>
      %48 = tpu.iota {dimensions = array<i32: 1>} : vector<1x128xi32>
      %c0_25 = arith.constant 0 : index
      %c0_26 = arith.constant 0 : index
      %c0_27 = arith.constant 0 : index
      %49 = vector.load %arg10[%c0_25, %c0_26, %c0_27] : memref<1x1x128xf32, #tpu.memory_space<vmem>>, vector<1x1x128xf32>
      %50 = vector.shape_cast %49 : vector<1x1x128xf32> to vector<1x128xf32>
      %c0_i32_28 = arith.constant 0 : i32
      %51 = vector.broadcast %c0_i32_28 : i32 to vector<1x128xi32>
      %52 = arith.cmpi eq, %48, %51 : vector<1x128xi32>
      %cst_29 = arith.constant 0.000000e+00 : f32
      %53 = vector.shape_cast %47 : vector<1x1xf32> to vector<1x1xf32>
      %54 = vector.broadcast %53 : vector<1x1xf32> to vector<1x128xf32>
      %55 = vector.broadcast %cst_29 : f32 to vector<1x128xf32>
      %56 = arith.select %52, %54, %55 : vector<1x128xi1>, vector<1x128xf32>
      %57 = arith.addf %50, %56 : vector<1x128xf32>
      %c0_30 = arith.constant 0 : index
      %c0_31 = arith.constant 0 : index
      %c0_32 = arith.constant 0 : index
      %58 = vector.load %arg10[%c0_30, %c0_31, %c0_32] : memref<1x1x128xf32, #tpu.memory_space<vmem>>, vector<1x1x128xf32>
      %59 = vector.shape_cast %58 : vector<1x1x128xf32> to vector<1x128xf32>
      %60 = vector.shape_cast %57 : vector<1x128xf32> to vector<1x1x128xf32>
      tpu.vector_store %arg10[%c0_30, %c0_31, %c0_32], %60 {strides = array<i32>} : memref<1x1x128xf32, #tpu.memory_space<vmem>>, vector<1x1x128xf32>,
    } else {
    }
    return
  }
  func.func @transform_0(%arg0: i32, %arg1: i32) -> (i32, i32, i32) {
    %c0_i32 = arith.constant 0 : i32
    %c0_i32_0 = arith.constant 0 : i32
    %c0_i32_1 = arith.constant 0 : i32
    return %arg0, %c0_i32, %c0_i32_0 : i32, i32, i32
  }
  func.func @transform_1(%arg0: i32, %arg1: i32) -> (i32, i32, i32) {
    %c0_i32 = arith.constant 0 : i32
    %c0_i32_0 = arith.constant 0 : i32
    return %arg0, %arg1, %c0_i32 : i32, i32, i32
  }
  func.func @transform_2(%arg0: i32, %arg1: i32) -> (i32, i32, i32) {
    %c0_i32 = arith.constant 0 : i32
    %c0_i32_0 = arith.constant 0 : i32
    %c0_i32_1 = arith.constant 0 : i32
    return %arg0, %c0_i32, %c0_i32_0 : i32, i32, i32
  }
  func.func @transform_3(%arg0: i32, %arg1: i32) -> (i32, i32, i32) {
    %c0_i32 = arith.constant 0 : i32
    %c0_i32_0 = arith.constant 0 : i32
    %c0_i32_1 = arith.constant 0 : i32
    return %arg0, %c0_i32, %c0_i32_0 : i32, i32, i32
  }
  func.func @transform_4(%arg0: i32, %arg1: i32) -> (i32, i32) {
    %c0_i32 = arith.constant 0 : i32
    %c0_i32_0 = arith.constant 0 : i32
    %c0_i32_1 = arith.constant 0 : i32
    return %c0_i32, %c0_i32_0 : i32, i32
  }
  func.func @transform_5(%arg0: i32, %arg1: i32) -> (i32, i32) {
    %c0_i32 = arith.constant 0 : i32
    %c0_i32_0 = arith.constant 0 : i32
    %c0_i32_1 = arith.constant 0 : i32
    return %c0_i32, %c0_i32_0 : i32, i32
  }
  func.func @transform_6(%arg0: i32, %arg1: i32) -> (i32, i32, i32) {
    %c0_i32 = arith.constant 0 : i32
    %c0_i32_0 = arith.constant 0 : i32
    %c0_i32_1 = arith.constant 0 : i32
    return %arg0, %c0_i32, %c0_i32_0 : i32, i32, i32
  }
  func.func @transform_7(%arg0: i32, %arg1: i32) -> (i32, i32, i32) {
    %c0_i32 = arith.constant 0 : i32
    %c0_i32_0 = arith.constant 0 : i32
    %c0_i32_1 = arith.constant 0 : i32
    return %arg0, %c0_i32, %c0_i32_0 : i32, i32, i32
  }
  func.func @transform_8(%arg0: i32, %arg1: i32) -> (i32, i32, i32) {
    %c0_i32 = arith.constant 0 : i32
    %c0_i32_0 = arith.constant 0 : i32
    %c0_i32_1 = arith.constant 0 : i32
    return %arg0, %c0_i32, %c0_i32_0 : i32, i32, i32
  }
}

</mosaic_0001>

<bundles_post_ra>
// kernel: custom-call.12
= control target key start
LH: loop header
LB: loop body
LE: loop exit
PB: predicated region body
PF: predicated region fallthrough
CT: control target
= control target key end

     0   :  { %s6_s0 = inlined_call_operand.vmem [shape: u32[2], index: 0, kind: output, shape index: {}]  }

// kernel: net_forward.3
= control target key start
LH: loop header
LB: loop body
LE: loop exit
PB: predicated region body
PF: predicated region fallthrough
CT: control target
= control target key end

     0   :  { %vm32_vm0 = vcmask 130048   ;;  %v572_v3 = vmov 0   ;;  %s735_s1 = inlined_call_operand.vmem [shape: f32[16,128], index: 1, kind: input, shape index: {}]   ;;  %s736_s0 = inlined_call_operand.vmem [shape: f32[128,16], index: 0, kind: input, shape index: {}]   ;;  %s737_s2 = inlined_call_operand.vmem [shape: f32[128,1], index: 2, kind: input, shape index: {}]   ;;  %s738_s3 = inlined_call_operand.vmem [shape: bf16[128,128], index: 3, kind: output, shape index: {}]  }
   0x1   :  { %v30_v0 = vld [vmem:[%s735_s1] sm:$0xff]  ;;  %v31_v1 = vld [vmem:[%s735_s1 + $0x8] sm:$0xff]  ;;  %571 = vset.pattern.permute.xlu1 %v572_v3  ;;  %570 = vset.pattern.permute.xlu0 %v572_v3  ;;  %v16_v8 = vld [vmem:[%s736_s0 + $0x10] sm:$0xff] }
   0x2   :  { %v14_v2 = vld [vmem:[%s736_s0] sm:$0xff]  ;;  %v563_v4 = vpack.c.bf16 %v31_v1, %v30_v0  ;;  %v15_v6 = vld [vmem:[%s736_s0 + $0x8] sm:$0xff]  ;;  %v24_v9 = vld [vmem:[%s736_s0 + $0x50] sm:$0xff] }
   0x3   :  { %539 = vmatprep.mubr.msk.f32.mxu0 %vm32_vm0, %v14_v2  ;;  %v22_v5 = vld [vmem:[%s736_s0 + $0x40] sm:$0xff]  ;;  %v23_v7 = vld [vmem:[%s736_s0 + $0x48] sm:$0xff]  ;;  %v228_v10 = vld [vmem:[%s737_s2 + $0x10] sm:$0xff] }
   0x4   :  { %551 = vmatprep.mubr.msk.f32.mxu1 %vm32_vm0, %v22_v5  ;;  %564 = vmatprep.subr.bf16.mxu0 %v563_v4  ;;  %v226_v11 = vld [vmem:[%s737_s2] sm:$0xff]  ;;  %v17_v12 = vld [vmem:[%s736_s0 + $0x18] sm:$0xff]  ;;  %v227_v17 = vld [vmem:[%s737_s2 + $0x8] sm:$0xff] }
   0x5   :  { %567 = vmatprep.subr.bf16.mxu1 %v563_v4  ;;  %566 = vmatpush3.bf16.msra.mxu0 %v563_v4  ;;  %v25_v13 = vld [vmem:[%s736_s0 + $0x58] sm:$0xff]  ;;  %v18_v14 = vld [vmem:[%s736_s0 + $0x20] sm:$0xff]  ;;  %v19_v18 = vld [vmem:[%s736_s0 + $0x28] sm:$0xff] }
   0x6   :  { %568 = vmatpush3.bf16.msra.mxu1 %v563_v4  ;;  %v26_v15 = vld [vmem:[%s736_s0 + $0x60] sm:$0xff]  ;;  %254 = vperm.xlu1 %571, %v228_v10   ;;  %v229_v16 = vld [vmem:[%s737_s2 + $0x18] sm:$0xff]  ;;  %v27_v19 = vld [vmem:[%s736_s0 + $0x68] sm:$0xff] }
   0x7   :  { %244 = vperm.xlu0 %570, %v226_v11   ;;  %v20_v20 = vld [vmem:[%s736_s0 + $0x30] sm:$0xff]  ;;  %v231_v22 = vld [vmem:[%s737_s2 + $0x28] sm:$0xff]  ;;  %v230_v23 = vld [vmem:[%s737_s2 + $0x20] sm:$0xff] }
   0x8   :  { %540 = vmatmul.mubr.msk.f32.vlgmr.msra.gmra.mrb[0].mxu0 %vm32_vm0, %v15_v6  ;;  %v28_v21 = vld [vmem:[%s736_s0 + $0x70] sm:$0xff]  ;;  %v21_v24 = vld [vmem:[%s736_s0 + $0x38] sm:$0xff]  ;;  %v235_v28 = vld [vmem:[%s737_s2 + $0x48] sm:$0xff] }
   0x9   :  { %552 = vmatmul.mubr.msk.f32.vlgmr.msra.gmra.mrb[0].mxu1 %vm32_vm0, %v23_v7  ;;  %542 = vmatprep.mubr.msk.f32.mxu0 %vm32_vm0, %v16_v8  ;;  %v29_v25 = vld [vmem:[%s736_s0 + $0x78] sm:$0xff]  ;;  %v232_v27 = vld [vmem:[%s737_s2 + $0x30] sm:$0xff]  ;;  %v234_v29 = vld [vmem:[%s737_s2 + $0x40] sm:$0xff] }
   0xa   :  { %554 = vmatprep.mubr.msk.f32.mxu1 %vm32_vm0, %v24_v9  ;;  %259 = vperm.xlu1 %571, %v229_v16   ;;  %v233_v26 = vld [vmem:[%s737_s2 + $0x38] sm:$0xff]  ;;  %v236_v31 = vld [vmem:[%s737_s2 + $0x50] sm:$0xff]  ;;  %v239_v32 = vld [vmem:[%s737_s2 + $0x68] sm:$0xff] }
   0xb   :  { %249 = vperm.xlu0 %570, %v227_v17   ;;  %v237_v30 = vld [vmem:[%s737_s2 + $0x58] sm:$0xff]  ;;  %v238_v33 = vld [vmem:[%s737_s2 + $0x60] sm:$0xff]  ;;  %v240_v35 = vld [vmem:[%s737_s2 + $0x70] sm:$0xff] }
   0xc   :  { %543 = vmatmul.mubr.msk.f32.gmra.mrb[2].mxu0 %vm32_vm0, %v17_v12  ;;  %v241_v34 = vld [vmem:[%s737_s2 + $0x78] sm:$0xff] }
   0xd   :  { %555 = vmatmul.mubr.msk.f32.gmra.mrb[2].mxu1 %vm32_vm0, %v25_v13  ;;  %545 = vmatprep.mubr.msk.f32.mxu0 %vm32_vm0, %v18_v14 }
   0xe   :  { %557 = vmatprep.mubr.msk.f32.mxu1 %vm32_vm0, %v26_v15  ;;  %269 = vperm.xlu1 %571, %v231_v22  }
   0xf   :  { %264 = vperm.xlu0 %570, %v230_v23  }
  0x10   :  { %546 = vmatmul.mubr.msk.f32.gmra.mrb[4].mxu0 %vm32_vm0, %v19_v18 }
  0x11   :  { %558 = vmatmul.mubr.msk.f32.gmra.mrb[4].mxu1 %vm32_vm0, %v27_v19  ;;  %548 = vmatprep.mubr.msk.f32.mxu0 %vm32_vm0, %v20_v20 }
  0x12   :  { %560 = vmatprep.mubr.msk.f32.mxu1 %vm32_vm0, %v28_v21  ;;  %279 = vperm.xlu1 %571, %v233_v26  }
  0x13   :  { %274 = vperm.xlu0 %570, %v232_v27  }
  0x14   :  { %549 = vmatmul.mubr.msk.f32.gmra.mrb[6].mxu0 %vm32_vm0, %v21_v24 }
  0x15   :  { %561 = vmatmul.mubr.msk.f32.gmra.mrb[6].mxu1 %vm32_vm0, %v29_v25 }
  0x16   :  { %289 = vperm.xlu1 %571, %v235_v28  }
  0x17   :  { %284 = vperm.xlu0 %570, %v234_v29  }
  0x1a   :  { %299 = vperm.xlu1 %571, %v237_v30  }
  0x1b   :  { %294 = vperm.xlu0 %570, %v236_v31  }
  0x1e   :  { %309 = vperm.xlu1 %571, %v239_v32  }
  0x1f   :  { %304 = vperm.xlu0 %570, %v238_v33  }
  0x22   :  { %319 = vperm.xlu1 %571, %v241_v34  }
  0x23   :  { %314 = vperm.xlu0 %570, %v240_v35  }
  0x85   :  { %v255_v36 = vpop.permute.xlu1 %254 }
  0x86   :  { %v245_v37 = vpop.permute.xlu0 %244 }
  0x89   :  { %v260_v38 = vpop.permute.xlu1 %259 }
  0x8a   :  { %v250_v39 = vpop.permute.xlu0 %249 }
  0x8d   :  { %v270_v40 = vpop.permute.xlu1 %269 }
  0x8e   :  { %v265_v41 = vpop.permute.xlu0 %264 }
  0x91   :  { %v280_v42 = vpop.permute.xlu1 %279 }
  0x92   :  { %v275_v43 = vpop.permute.xlu0 %274 }
  0x95   :  { %v290_v44 = vpop.permute.xlu1 %289 }
  0x96   :  { %v285_v45 = vpop.permute.xlu0 %284 }
  0x99   :  { %v300_v46 = vpop.permute.xlu1 %299 }
  0x9a   :  { %v295_v47 = vpop.permute.xlu0 %294 }
  0x9d   :  { %v310_v56 = vpop.permute.xlu1 %309 }
  0x9e   :  { %v305_v57 = vpop.permute.xlu0 %304 }
  0xa1   :  { %v320_v14 = vpop.permute.xlu1 %319 }
  0xa2   :  { %v315_v15 = vpop.permute.xlu0 %314 }
  0xdb   :  { %v541_v48 = vpop.f32.mrb[0].mxu0 }
  0xdc   :  { %v553_v49 = vpop.f32.mrb[0].mxu1  ;;  %v323_v50 = vmul.f32 %v541_v48, %v250_v39  ;;  %v147_v52 = vpop.f32.mrb[1].mxu0 }
  0xdd   :  { %v331_v51 = vmul.f32 %v553_v49, %v290_v44  ;;  %v187_v53 = vpop.f32.mrb[1].mxu1  ;;  %v322_v54 = vmul.f32 %v245_v37, %v147_v52 }
  0xde   :  { %v330_v55 = vmul.f32 %v285_v45, %v187_v53 }
  0xdf   :  { %v473_v58 = vpack.c.bf16 %v323_v50, %v322_v54  ;;  %v544_v60 = vpop.f32.mrb[2].mxu0 }
  0xe0   :  { %v493_v59 = vpack.c.bf16 %v331_v51, %v330_v55  ;;  %v556_v61 = vpop.f32.mrb[2].mxu1  ;;  %v325_v62 = vmul.f32 %v544_v60, %v260_v38  ;;  %v157_v0 = vpop.f32.mrb[3].mxu0 }
  0xe1   :  { %v333_v63 = vmul.f32 %v556_v61, %v300_v46  ;;  %v197_v1 = vpop.f32.mrb[3].mxu1  ;;  %474 = vst [vmem:[%s738_s3] sm:$0xff] %v473_v58   ;;  %v324_v2 = vmul.f32 %v255_v36, %v157_v0 }
  0xe2   :  { %513 = vst [vmem:[%s738_s3 + $0x20] sm:$0xff] %v493_v59   ;;  %v332_v3 = vmul.f32 %v295_v47, %v197_v1 }
  0xe3   :  { %v478_v4 = vpack.c.bf16 %v325_v62, %v324_v2  ;;  %v547_v6 = vpop.f32.mrb[4].mxu0 }
  0xe4   :  { %v498_v5 = vpack.c.bf16 %v333_v63, %v332_v3  ;;  %v559_v7 = vpop.f32.mrb[4].mxu1  ;;  %v327_v8 = vmul.f32 %v547_v6, %v270_v40  ;;  %v167_v10 = vpop.f32.mrb[5].mxu0 }
  0xe5   :  { %v335_v9 = vmul.f32 %v559_v7, %v310_v56  ;;  %v207_v11 = vpop.f32.mrb[5].mxu1  ;;  %510 = vst [vmem:[%s738_s3 + $0x8] sm:$0xff] %v478_v4   ;;  %v326_v12 = vmul.f32 %v265_v41, %v167_v10 }
  0xe6   :  { %514 = vst [vmem:[%s738_s3 + $0x28] sm:$0xff] %v498_v5   ;;  %v334_v13 = vmul.f32 %v305_v57, %v207_v11 }
  0xe7   :  { %v483_v16 = vpack.c.bf16 %v327_v8, %v326_v12  ;;  %v550_v18 = vpop.f32.mrb[6].mxu0 }
  0xe8   :  { %v503_v17 = vpack.c.bf16 %v335_v9, %v334_v13  ;;  %v562_v19 = vpop.f32.mrb[6].mxu1  ;;  %v329_v20 = vmul.f32 %v550_v18, %v280_v42  ;;  %v177_v22 = vpop.f32.mrb[7].mxu0 }
  0xe9   :  { %v337_v21 = vmul.f32 %v562_v19, %v320_v14  ;;  %v217_v23 = vpop.f32.mrb[7].mxu1  ;;  %511 = vst [vmem:[%s738_s3 + $0x10] sm:$0xff] %v483_v16   ;;  %v328_v24 = vmul.f32 %v275_v43, %v177_v22 }
  0xea   :  { %515 = vst [vmem:[%s738_s3 + $0x30] sm:$0xff] %v503_v17   ;;  %v336_v25 = vmul.f32 %v315_v15, %v217_v23 }
  0xeb   :  { %v488_v26 = vpack.c.bf16 %v329_v20, %v328_v24 }
  0xec   :  { %v508_v27 = vpack.c.bf16 %v337_v21, %v336_v25 }
  0xed   :  { %512 = vst [vmem:[%s738_s3 + $0x18] sm:$0xff] %v488_v26  }
  0xee   :  { %516 = vst [vmem:[%s738_s3 + $0x38] sm:$0xff] %v508_v27  }

// kernel: net_forward.4
= control target key start
LH: loop header
LB: loop body
LE: loop exit
PB: predicated region body
PF: predicated region fallthrough
CT: control target
= control target key end

     0   :  { %v751_v1 = vmov 0   ;;  %s927_s1 = inlined_call_operand.vmem [shape: bf16[128,128], index: 1, kind: input, shape index: {}]   ;;  %s928_s0 = inlined_call_operand.vmem [shape: bf16[128,128], index: 0, kind: input, shape index: {}]   ;;  %s929_s2 = inlined_call_operand.vmem [shape: f32[128,1], index: 2, kind: input, shape index: {}]   ;;  %s930_s3 = inlined_call_operand.vmem [shape: f32[1,128], index: 3, kind: input, shape index: {}]   ;;  %s931_s4 = inlined_call_operand.vmem [shape: bf16[128,128], index: 4, kind: output, shape index: {}]  }
   0x1   :  { %v735_v0 = vld [vmem:[%s927_s1] sm:$0xff]   ;;  %734 = vset.pattern.permute.xlu1 %v751_v1  ;;  %733 = vset.pattern.permute.xlu0 %v751_v1  ;;  %v736_v2 = vld [vmem:[%s927_s1 + $0x8] sm:$0xff]   ;;  %v737_v3 = vld [vmem:[%s927_s1 + $0x10] sm:$0xff]  }
   0x2   :  { %684 = vmatprep.subr.bf16.mxu0 %v735_v0  ;;  %716 = vmatprep.subr.bf16.mxu1 %v735_v0  ;;  %v738_v4 = vld [vmem:[%s927_s1 + $0x18] sm:$0xff]   ;;  %v743_v5 = vld [vmem:[%s928_s0] sm:$0xff]   ;;  %v740_v8 = vld [vmem:[%s927_s1 + $0x28] sm:$0xff]  }
   0x3   :  { %685 = vmatpush3.bf16.msra.mxu0 %v735_v0  ;;  %724 = vmatpush3.bf16.msra.mxu1 %v735_v0  ;;  %v744_v6 = vld [vmem:[%s928_s0 + $0x20] sm:$0xff]   ;;  %v337_v9 = vld [vmem:[%s929_s2 + $0x10] sm:$0xff]  ;;  %v338_v11 = vld [vmem:[%s929_s2 + $0x18] sm:$0xff] }
   0x4   :  { %686 = vmatprep.subr.bf16.mxu0 %v736_v2  ;;  %717 = vmatprep.subr.bf16.mxu1 %v736_v2  ;;  %v739_v7 = vld [vmem:[%s927_s1 + $0x20] sm:$0xff]   ;;  %v336_v12 = vld [vmem:[%s929_s2 + $0x8] sm:$0xff]  ;;  %v741_v13 = vld [vmem:[%s927_s1 + $0x30] sm:$0xff]  }
   0x5   :  { %700 = vmatprep.mubr.bf16.mxu0 %v743_v5  ;;  %708 = vmatprep.mubr.bf16.mxu1 %v744_v6  ;;  %v335_v10 = vld [vmem:[%s929_s2] sm:$0xff]  ;;  %v340_v14 = vld [vmem:[%s929_s2 + $0x28] sm:$0xff]  ;;  %v742_v16 = vld [vmem:[%s927_s1 + $0x38] sm:$0xff]  }
   0x6   :  { %363 = vperm.xlu1 %734, %v337_v9   ;;  %353 = vperm.xlu0 %733, %v335_v10   ;;  %v339_v15 = vld [vmem:[%s929_s2 + $0x20] sm:$0xff]  ;;  %v342_v17 = vld [vmem:[%s929_s2 + $0x38] sm:$0xff]  ;;  %v341_v18 = vld [vmem:[%s929_s2 + $0x30] sm:$0xff] }
   0x7   :  { %687 = vmatpush3.bf16.msra.mxu0 %v736_v2  ;;  %725 = vmatpush3.bf16.msra.mxu1 %v736_v2  ;;  %v745_v19 = vld [vmem:[%s928_s0 + $0x8] sm:$0xff]   ;;  %v343_v22 = vld [vmem:[%s929_s2 + $0x40] sm:$0xff]  ;;  %v747_v23 = vld [vmem:[%s928_s0 + $0x10] sm:$0xff]  }
   0x8   :  { %688 = vmatprep.subr.bf16.mxu0 %v737_v3  ;;  %718 = vmatprep.subr.bf16.mxu1 %v737_v3  ;;  %v746_v20 = vld [vmem:[%s928_s0 + $0x28] sm:$0xff]   ;;  %v748_v24 = vld [vmem:[%s928_s0 + $0x30] sm:$0xff]   ;;  %v346_v25 = vld [vmem:[%s929_s2 + $0x58] sm:$0xff] }
   0x9   :  { %v344_v21 = vld [vmem:[%s929_s2 + $0x48] sm:$0xff]  ;;  %v345_v26 = vld [vmem:[%s929_s2 + $0x50] sm:$0xff]  ;;  %v749_v27 = vld [vmem:[%s928_s0 + $0x18] sm:$0xff]  }
   0xa   :  { %368 = vperm.xlu1 %734, %v338_v11   ;;  %358 = vperm.xlu0 %733, %v336_v12   ;;  %v750_v28 = vld [vmem:[%s928_s0 + $0x38] sm:$0xff]   ;;  %v348_v29 = vld [vmem:[%s929_s2 + $0x68] sm:$0xff]  ;;  %v347_v30 = vld [vmem:[%s929_s2 + $0x60] sm:$0xff] }
   0xb   :  { %689 = vmatpush3.bf16.msra.mxu0 %v737_v3  ;;  %726 = vmatpush3.bf16.msra.mxu1 %v737_v3  ;;  %v350_v31 = vld [vmem:[%s929_s2 + $0x78] sm:$0xff]  ;;  %v349_v32 = vld [vmem:[%s929_s2 + $0x70] sm:$0xff]  ;;  %v882_v48 = vld [vmem:[%s930_s3] ss:$0 sm:$0xff] }
   0xc   :  { %690 = vmatprep.subr.bf16.mxu0 %v738_v4  ;;  %719 = vmatprep.subr.bf16.mxu1 %v738_v4 }
   0xe   :  { %378 = vperm.xlu1 %734, %v340_v14   ;;  %373 = vperm.xlu0 %733, %v339_v15  }
   0xf   :  { %691 = vmatpush3.bf16.msra.mxu0 %v738_v4  ;;  %727 = vmatpush3.bf16.msra.mxu1 %v738_v4 }
  0x10   :  { %692 = vmatprep.subr.bf16.mxu0 %v739_v7  ;;  %720 = vmatprep.subr.bf16.mxu1 %v739_v7 }
  0x12   :  { %388 = vperm.xlu1 %734, %v342_v17   ;;  %383 = vperm.xlu0 %733, %v341_v18  }
  0x13   :  { %693 = vmatpush3.bf16.msra.mxu0 %v739_v7  ;;  %728 = vmatpush3.bf16.msra.mxu1 %v739_v7 }
  0x14   :  { %694 = vmatprep.subr.bf16.mxu0 %v740_v8  ;;  %721 = vmatprep.subr.bf16.mxu1 %v740_v8 }
  0x16   :  { %398 = vperm.xlu1 %734, %v344_v21   ;;  %393 = vperm.xlu0 %733, %v343_v22  }
  0x17   :  { %695 = vmatpush3.bf16.msra.mxu0 %v740_v8  ;;  %729 = vmatpush3.bf16.msra.mxu1 %v740_v8 }
  0x18   :  { %696 = vmatprep.subr.bf16.mxu0 %v741_v13  ;;  %722 = vmatprep.subr.bf16.mxu1 %v741_v13 }
  0x1a   :  { %408 = vperm.xlu1 %734, %v346_v25   ;;  %403 = vperm.xlu0 %733, %v345_v26  }
  0x1b   :  { %697 = vmatpush3.bf16.msra.mxu0 %v741_v13  ;;  %730 = vmatpush3.bf16.msra.mxu1 %v741_v13 }
  0x1c   :  { %698 = vmatprep.subr.bf16.mxu0 %v742_v16  ;;  %723 = vmatprep.subr.bf16.mxu1 %v742_v16 }
  0x1e   :  { %418 = vperm.xlu1 %734, %v348_v29   ;;  %413 = vperm.xlu0 %733, %v347_v30  }
  0x1f   :  { %699 = vmatpush3.bf16.msra.mxu0 %v742_v16  ;;  %731 = vmatpush3.bf16.msra.mxu1 %v742_v16 }
  0x22   :  { %701 = vmatmul.mubr.bf16.vlgmr.msra.gmra.mrb[0].mxu0 %v745_v19  ;;  %709 = vmatmul.mubr.bf16.vlgmr.msra.gmra.mrb[0].mxu1 %v746_v20 }
  0x23   :  { %704 = vmatprep.mubr.bf16.mxu0 %v747_v23  ;;  %712 = vmatprep.mubr.bf16.mxu1 %v748_v24 }
  0x24   :  { %428 = vperm.xlu1 %734, %v350_v31   ;;  %423 = vperm.xlu0 %733, %v349_v32  }
  0x2a   :  { %705 = vmatmul.mubr.bf16.gmra.mrb[4].mxu0 %v749_v27  ;;  %713 = vmatmul.mubr.bf16.gmra.mrb[4].mxu1 %v750_v28 }
  0x85   :  { %v364_v33 = vpop.permute.xlu1 %363  ;;  %v354_v34 = vpop.permute.xlu0 %353 }
  0x89   :  { %v369_v35 = vpop.permute.xlu1 %368  ;;  %v359_v36 = vpop.permute.xlu0 %358 }
  0x8d   :  { %v873_v37 = vpop.permute.xlu1 %378  ;;  %v374_v38 = vpop.permute.xlu0 %373 }
  0x91   :  { %v875_v39 = vpop.permute.xlu1 %388  ;;  %v384_v40 = vpop.permute.xlu0 %383 }
  0x95   :  { %v399_v41 = vpop.permute.xlu1 %398  ;;  %v394_v42 = vpop.permute.xlu0 %393 }
  0x99   :  { %v409_v43 = vpop.permute.xlu1 %408  ;;  %v404_v44 = vpop.permute.xlu0 %403 }
  0x9d   :  { %v877_v45 = vpop.permute.xlu1 %418  ;;  %v414_v46 = vpop.permute.xlu0 %413 }
  0xa3   :  { %v429_v8 = vpop.permute.xlu1 %428  ;;  %v424_v9 = vpop.permute.xlu0 %423 }
  0xf5   :  { %v702_v47 = vpop.f32.mrb[0].mxu0  ;;  %v710_v49 = vpop.f32.mrb[0].mxu1 }
  0xf6   :  { %v433_v50 = vmul.f32 %v702_v47, %v364_v33  ;;  %v441_v51 = vmul.f32 %v710_v49, %v404_v44  ;;  %v221_v52 = vpop.f32.mrb[1].mxu0  ;;  %v253_v53 = vpop.f32.mrb[1].mxu1 }
  0xf7   :  { %v431_v54 = vmul.f32 %v354_v34, %v221_v52  ;;  %v439_v55 = vmul.f32 %v394_v42, %v253_v53  ;;  %v703_v56 = vpop.f32.mrb[2].mxu0  ;;  %v711_v57 = vpop.f32.mrb[2].mxu1 }
  0xf8   :  { %v456_v58 = vadd.f32 %v882_v48, %v433_v50  ;;  %v464_v59 = vadd.f32 %v882_v48, %v441_v51  ;;  %v434_v60 = vmul.f32 %v703_v56, %v369_v35  ;;  %v442_v61 = vmul.f32 %v711_v57, %v409_v43  ;;  %v224_v62 = vpop.f32.mrb[3].mxu0  ;;  %v256_v63 = vpop.f32.mrb[3].mxu1 }
  0xf9   :  { %v454_v0 = vadd.f32 %v882_v48, %v431_v54  ;;  %v462_v1 = vadd.f32 %v882_v48, %v439_v55  ;;  %v432_v2 = vmul.f32 %v359_v36, %v224_v62  ;;  %v440_v3 = vmul.f32 %v399_v41, %v256_v63 }
  0xfa   :  { %v457_v4 = vadd.f32 %v882_v48, %v434_v60  ;;  %v465_v5 = vadd.f32 %v882_v48, %v442_v61  ;;  %v472_v10 = vmax.f32 %v456_v58, 0.0  ;;  %v480_v11 = vmax.f32 %v464_v59, 0.0 }
  0xfb   :  { %v455_v6 = vadd.f32 %v882_v48, %v432_v2  ;;  %v463_v7 = vadd.f32 %v882_v48, %v440_v3  ;;  %v470_v14 = vmax.f32 %v454_v0, 0.0  ;;  %v478_v15 = vmax.f32 %v462_v1, 0.0 }
  0xfc   :  { %v473_v12 = vmax.f32 %v457_v4, 0.0  ;;  %v481_v13 = vmax.f32 %v465_v5, 0.0 }
  0xfd   :  { %v471_v16 = vmax.f32 %v455_v6, 0.0  ;;  %v479_v17 = vmax.f32 %v463_v7, 0.0  ;;  %v706_v18 = vpop.f32.mrb[4].mxu0  ;;  %v714_v19 = vpop.f32.mrb[4].mxu1 }
  0xfe   :  { %v629_v20 = vpack.c.bf16 %v473_v12, %v472_v10  ;;  %v649_v21 = vpack.c.bf16 %v481_v13, %v480_v11  ;;  %v437_v22 = vmul.f32 %v706_v18, %v384_v40  ;;  %v445_v23 = vmul.f32 %v714_v19, %v424_v9  ;;  %v237_v24 = vpop.f32.mrb[5].mxu0  ;;  %v269_v25 = vpop.f32.mrb[5].mxu1 }
  0xff   :  { %v624_v26 = vpack.c.bf16 %v471_v16, %v470_v14  ;;  %v644_v27 = vpack.c.bf16 %v479_v17, %v478_v15  ;;  %v435_v28 = vmul.f32 %v374_v38, %v237_v24  ;;  %v443_v29 = vmul.f32 %v414_v46, %v269_v25  ;;  %v707_v30 = vpop.f32.mrb[6].mxu0  ;;  %v715_v31 = vpop.f32.mrb[6].mxu1 }
 0x100   :  { %661 = vst [vmem:[%s931_s4 + $0x8] sm:$0xff] %v629_v20   ;;  %665 = vst [vmem:[%s931_s4 + $0x28] sm:$0xff] %v649_v21   ;;  %v460_v32 = vadd.f32 %v882_v48, %v437_v22  ;;  %v468_v33 = vadd.f32 %v882_v48, %v445_v23  ;;  %v438_v34 = vmul.f32 %v707_v30, %v875_v39  ;;  %v240_v36 = vpop.f32.mrb[7].mxu0  ;;  %v272_v38 = vpop.f32.mrb[7].mxu1 }
 0x101   :  { %v446_v35 = vmul.f32 %v715_v31, %v429_v8  ;;  %625 = vst [vmem:[%s931_s4] sm:$0xff] %v624_v26   ;;  %664 = vst [vmem:[%s931_s4 + $0x20] sm:$0xff] %v644_v27   ;;  %v458_v40 = vadd.f32 %v882_v48, %v435_v28  ;;  %v466_v41 = vadd.f32 %v882_v48, %v443_v29 }
 0x102   :  { %v436_v42 = vmul.f32 %v873_v37, %v240_v36  ;;  %v444_v43 = vmul.f32 %v877_v45, %v272_v38  ;;  %v461_v39 = vadd.f32 %v882_v48, %v438_v34  ;;  %v476_v49 = vmax.f32 %v460_v32, 0.0 }
 0x103   :  { %v469_v44 = vadd.f32 %v882_v48, %v446_v35  ;;  %v484_v50 = vmax.f32 %v468_v33, 0.0  ;;  %v474_v53 = vmax.f32 %v458_v40, 0.0  ;;  %v482_v54 = vmax.f32 %v466_v41, 0.0 }
 0x104   :  { %v459_v46 = vadd.f32 %v882_v48, %v436_v42  ;;  %v467_v47 = vadd.f32 %v882_v48, %v444_v43  ;;  %v477_v51 = vmax.f32 %v461_v39, 0.0 }
 0x105   :  { %v485_v52 = vmax.f32 %v469_v44, 0.0 }
 0x106   :  { %v475_v55 = vmax.f32 %v459_v46, 0.0  ;;  %v483_v56 = vmax.f32 %v467_v47, 0.0  ;;  %v639_v57 = vpack.c.bf16 %v477_v51, %v476_v49 }
 0x107   :  { %v659_v37 = vpack.c.bf16 %v485_v52, %v484_v50 }
 0x108   :  { %v634_v58 = vpack.c.bf16 %v475_v55, %v474_v53  ;;  %v654_v45 = vpack.c.bf16 %v483_v56, %v482_v54  ;;  %663 = vst [vmem:[%s931_s4 + $0x18] sm:$0xff] %v639_v57  }
 0x109   :  { %667 = vst [vmem:[%s931_s4 + $0x38] sm:$0xff] %v659_v37  }
 0x10a   :  { %662 = vst [vmem:[%s931_s4 + $0x10] sm:$0xff] %v634_v58   ;;  %666 = vst [vmem:[%s931_s4 + $0x30] sm:$0xff] %v654_v45  }

// kernel: net_forward.5
= control target key start
LH: loop header
LB: loop body
LE: loop exit
PB: predicated region body
PF: predicated region fallthrough
CT: control target
= control target key end

     0   :  { %14 = vsyncpa [#allocation6], 0  ;;  %s2723_s0 = inlined_call_operand.vmem [shape: bf16[2,8,128], index: 0, kind: input, shape index: {}]   ;;  %s2724_s1 = inlined_call_operand.vmem [shape: bf16[2,8,8], index: 1, kind: input, shape index: {}]   ;;  %s2725_s2 = inlined_call_operand.vmem [shape: f32[2,8,1], index: 2, kind: input, shape index: {}]   ;;  %s2726_s3 = inlined_call_operand.vmem [shape: f32[2,8,1], index: 3, kind: input, shape index: {}]   ;;  %s2727_s4 = inlined_call_operand.vmem [shape: bf16[128,128], index: 4, kind: input, shape index: {}]   ;;  %s2728_s5 = inlined_call_operand.vmem [shape: f32[1,128], index: 5, kind: input, shape index: {}]   ;;  %s2729_s6 = inlined_call_operand.hbm [shape: f32[2,8,128], index: 6, kind: output, shape index: {0}]   ;;  %s2730_s7 = inlined_call_operand.vmem [shape: f32[2,128,128], index: 7, kind: output, shape index: {1}]   ;;  %s2731_s8 = inlined_call_operand.vmem [shape: f32[2,1,128], index: 8, kind: output, shape index: {2}]  }
   0x1   :  { %16 = vsyncpa [#allocation6 + $0x1], 0  ;;  %s2169_s27 = smov 0   ;;  %s2171_s28 = smov 0  }
   0x2   :  { %s2173_s29 = smov 0   ;;  %s2175_s30 = smov 0  }
   0x3   :  { %s2177_s9 = smov 0   ;;  %s2179_s10 = smov 0  }
   0x4 LB: > { %s1689_s11 = sadd.s32 4294967295, %s2118_s10   ;;  %s1690_s12 = sadd.s32 4294967294, %s2118_s10   ;;  %s2118_s10 = sphi %s2179_s10, %s22_s10   ;;  %s2114_s9 = sphi %s2177_s9, %s2738_s9   ;;  %s2110_s30 = sphi %s2175_s30, %s2737_s30   ;;  %s2106_s29 = sphi %s2173_s29, %s2736_s29   ;;  %s2102_s28 = sphi %s2171_s28, %s2735_s28   ;;  %s2098_s27 = sphi %s2169_s27, %s2734_s27  }
   0x5   : > { %s34_s13 = sadd.s32 1, %s2114_s9  ;;  %s189_s14 = sadd.s32 1, %s2106_s29 }
   0x6   : > { %p36_p0 = scmp.ge.s32.totalorder %s34_s13, 2  ;;  %p199_p1 = scmp.ne.s32.totalorder %s2106_s29, %s2102_s28 }
   0x7   : > { %p200_p2 = scmp.eq.s32.totalorder %s1689_s11, 1  ;;  %p205_p3 = scmp.ne.s32.totalorder %s2102_s28, %s2098_s27 }
   0x8   : > { %s2740_s13 = smov (%p36_p0, %s34_s13), 0  ;;  %p206_p5 = scmp.eq.s32.totalorder %s1690_s12, 1 }
   0x9   : > { %p2209_p4 = por %p200_p2, %p199_p1  ;;  %s186_s16 = ssub.s32 %s2114_s9, %s2740_s13 }
   0xa   : > { %p1693_p6 = scmp.ge.s32.totalorder %s2118_s10, 1  ;;  %p187_p7 = scmp.eq.s32.totalorder %s186_s16, 0 }
   0xb   : > { %p2216_p8 = por %p206_p5, %p205_p3  ;;  %p313_p9 = scmp.lt.s32.totalorder %s2118_s10, 3 }
   0xc   : > { %s2222_s18 = scalar_select %p187_p7, %s2106_s29, %s189_s14  }
   0xd   : > { %p314_p10 = pnand %p1693_p6, %p313_p9 }
   0xe   : > { %v1920_v0 = vld [vmem:[%s2727_s4] sm:$0xff] (!%p314_p10)   ;;  %v2120_v1 = vmov (!%p314_p10), 0.0   ;;  %v1921_v2 = vld [vmem:[%s2727_s4 + $0x8] sm:$0xff] (!%p314_p10)   ;;  %vm2121_vm0 = vmmov (!%p314_p10), 0   ;;  %v1922_v3 = vld [vmem:[%s2727_s4 + $0x10] sm:$0xff] (!%p314_p10)   ;;  %p369_p11 = scmp.lt.s32.totalorder (!%p314_p10), %s2110_s30, 1 }
   0xf   : > { %317 = sbr.rel (%p314_p10) target bundleno = 1474 (0x5c2), region = 44  ;;  %1779 = vmatprep.subr.bf16.mxu0 (!%p314_p10), %v2120_v1  ;;  %1386 = vst [vmem:[#allocation3] sm:$0x1] (!%p314_p10), %v2120_v1  ;;  %1795 = vmatprep.mubr.msk.bf16.mxu0 (!%p314_p10), %vm2121_vm0, %v2120_v1  ;;  %v1923_v4 = vld [vmem:[%s2727_s4 + $0x18] sm:$0xff] (!%p314_p10)   ;;  %v1924_v5 = vld [vmem:[%s2727_s4 + $0x20] sm:$0xff] (!%p314_p10)   ;;  %v1925_v6 = vld [vmem:[%s2727_s4 + $0x28] sm:$0xff] (!%p314_p10)  }
  0x10   : > { %1780 = vmatpush3.bf16.msra.mxu0 (!%p314_p10), %v1920_v0  ;;  %v1926_v7 = vld [vmem:[%s2727_s4 + $0x30] sm:$0xff] (!%p314_p10)   ;;  %v1927_v8 = vld [vmem:[%s2727_s4 + $0x38] sm:$0xff] (!%p314_p10)   ;;  %v1701_v10 = vld [vmem:[%s2728_s5] ss:$0 sm:$0xff] (!%p314_p10)  ;;  %v2122_v16 = vmov (!%p314_p10), 0   ;;  %vm574_vm1 = vcmask (!%p314_p10), 1043456  }
  0x11   : > { %1781 = vmatprep.subr.bf16.mxu0 (!%p314_p10), %v2120_v1  ;;  %1918 = vset.pattern.permute.xlu1 (!%p314_p10), %v2122_v16  ;;  %s354_s24 = sand.u32 (!%p314_p10), 1, %s2102_s28   ;;  %vm549_vm2 = vcmask (!%p314_p10), 64512   ;;  %vm1331_vm12 = vcmask (!%p314_p10), 1040384   ;;  %vm1350_vm13 = vcmask (!%p314_p10), 7168   ;;  %s2123_s12 = smov (!%p314_p10), [#allocation5]  }
  0x12   : > { %1919 = vset.pattern.permute.xlu0 (!%p314_p10), %v2122_v16  ;;  %s2288_s25 = sshll.u32 (!%p314_p10), %s354_s24, 3 }
  0x13   : > { %s356_s26 = scalar_lea.vmem (!%p314_p10), [#allocation5], %s2288_s25 }
  0x14   : > { %1782 = vmatpush3.bf16.msra.mxu0 (!%p314_p10), %v1921_v2 }
  0x15   : > { %1783 = vmatprep.subr.bf16.mxu0 (!%p314_p10), %v2120_v1 }
  0x16   : > { %s2253_s19 = scalar_select %p369_p11, %s2110_s30, 1 }
  0x18   : > { %1784 = vmatpush3.bf16.msra.mxu0 %v1922_v3  ;;  %s1695_s22 = sshll.u32 %s2253_s19, 2  ;;  %s1697_s16 = sshll.u32 %s2253_s19, 3 }
  0x19   : > { %1785 = vmatprep.subr.bf16.mxu0 %v2120_v1  ;;  %s372_s11 = scalar_lea.vmem %s2723_s0, %s1695_s22  ;;  %s383_s23 = scalar_lea.vmem %s2725_s2, %s1697_s16 }
  0x1a   : > { %v401_v9 = vld [vmem:[%s372_s11] sm:$0xf]  ;;  %s379_s14 = scalar_lea.vmem %s2724_s1, %s1695_s22  ;;  %s387_s21 = scalar_lea.vmem %s2726_s3, %s1697_s16 }
  0x1b   : > { %v2278_v17 = vld [vmem:[%s383_s23] sm:$0xff]  ;;  %1844 = vmatprep.subr.msk.bf16.mxu1 %vm574_vm1, %v401_v9  ;;  %v576_v22 = vsel %vm574_vm1, %v401_v9, 0  ;;  %s1749_s23 = sshll.u32 %s2253_s19, 7  ;;  %s1746_s22 = sshll.u32 %s2110_s30, 7 }
  0x1c   : > { %1786 = vmatpush3.bf16.msra.mxu0 %v1923_v4  ;;  %526 = vperm.xlu1 %1918, %v2278_v17   ;;  %v1393_v34 = vld [vmem:[%s379_s14] sm:$0xf]  ;;  %s2621_s14 = scalar_lea.vmem %s2730_s7, %s1749_s23  ;;  %s1531_s23 = sshll.u32 %s356_s26, 4  ;;  %s2642_s23 = int_to_ptr.vmem [resolvable:$true] %s1531_s23 }
  0x1d   : > { %1787 = vmatprep.subr.bf16.mxu0 %v2120_v1  ;;  %1842 = vmatpush3.bf16.msra.mxu1 %v576_v22  ;;  %s1510_s11 = scalar_lea.sflag [#allocation6], %s354_s24  ;;  %s2040_s30 = scalar_lea.vmem %s2642_s23, 128 }
  0x1e   : > { %p2041_p12 = scmp.ne.s32.totalorder %s2642_s23, %s2040_s30 }
  0x20   : > { %1788 = vmatpush3.bf16.msra.mxu0 %v1924_v5  ;;  %p2042_p13 = pnand %p2041_p12, %p2209_p4 }
  0x21   : > { %1789 = vmatprep.subr.bf16.mxu0 %v2120_v1 }
  0x22   : > { %p2043_p0 = pneg %p2042_p13 }
  0x24   : > { %1790 = vmatpush3.bf16.msra.mxu0 %v1925_v6 }
  0x25   : > { %1791 = vmatprep.subr.bf16.mxu0 %v2120_v1 }
  0x28   : > { %1792 = vmatpush3.bf16.msra.mxu0 %v1926_v7 }
  0x29   : > { %1793 = vmatprep.subr.bf16.mxu0 %v2120_v1 }
  0x2c   : > { %1794 = vmatpush3.bf16.msra.mxu0 %v1927_v8 }
  0x2d   : > { %1843 = vmatprep.subr.msk.bf16.mxu0 %vm574_vm1, %v401_v9 }
  0x2f   : > { %1796 = vmatmul.mubr.bf16.vlgmr.msra.gmra.mrb[0].mxu0 %v401_v9 }
  0x30   : > { %1800 = vmatpush3.bf16.msra.mxu0 %v576_v22 }
  0x31   : > { %1835 = vmatprep.subr.bf16.mxu0 %v2120_v1 }
  0x9b   : > { %v527_v25 = vpop.permute.xlu1 %526 }
 0x102   : > { %v509_v11 = vpop.f32.mrb[0].mxu0 }
 0x103   : > { %v510_v12 = vadd.f32 %v1701_v10, %v509_v11  ;;  %v1797_v13 = vpop.f32.mrb[1].mxu0 }
 0x104   : > { %v512_v14 = vpop.f32.mrb[2].mxu0 }
 0x105   : > { %515 = vmax.xlane.f32.xlu0 %v510_v12  ;;  %v1798_v15 = vpop.f32.mrb[3].mxu0 }
 0x106   : > { %v1443_v15 = vld [vmem:[#allocation3] sm:$0x1] }
 0x192   : > { %v516_v18 = vpop.xlane.xlu0 %515 }
 0x193   : > { %v517_v19 = vsub.f32 %v510_v12, %v516_v18 }
 0x195   : > { %v518_v20 = vmul.f32 1.442695, %v517_v19 }
 0x197   : > { %1928 = vpow2.f32 %v518_v20 }
 0x1a1   : > { %v1929_v21 = vpop.eup %1928 }
 0x1a2   : > { %520 = vadd.xlane.f32.xlu0 %v1929_v21 }
 0x22f   : > { %v521_v23 = vpop.xlane.xlu0 %520 }
 0x230   : > { %1930 = vrcp.f32 %v521_v23 }
 0x23a   : > { %v1931_v24 = vpop.eup %1930 }
 0x23b   : > { %v523_v26 = vmul.f32 %v1931_v24, %v1929_v21 }
 0x23d   : > { %v2290_v27 = vmul.f32 %v527_v25, %v523_v26 }
 0x23f   : > { %v531_v28 = vpack.c.bf16 %v2290_v27, %v2290_v27  ;;  %530 = vst [vmem:[%s356_s26] sm:$0xff] %v2290_v27 }
 0x241   : > { %533 = vxpose.xlu1.c.b16.start.end [1/1] (short) %v531_v28, 128  ;;  %532 = vst [vmem:[#allocation2] sm:$0xf] %v531_v28  ;;  %1845 = vmatprep.subr.msk.bf16.mxu1 %vm574_vm1, %v531_v28  ;;  %v980_v36 = vsel %vm574_vm1, %v531_v28, 0 }
 0x248   : > { %v1394_v30 = vld [vmem:[#allocation2] sm:$0xf] }
 0x249   : > { %v1401_v32 = vsel %vm574_vm1, %v1394_v30, 0  ;;  %v1392_v50 = vld [vmem:[#allocation2] sm:$0xf] }
 0x24a   : > { %v1444_v52 = vunpack.c.l.bf16 %v1392_v50 }
 0x2a7   : > { %v541_v29 = vpop.trf.xlu1 }
 0x2a8   : > { %1801 = vmatprep.mubr.msk.bf16.mxu0 %vm549_vm2, %v541_v29 }
 0x2ab   : > { %v542_v31 = vpop.trf.xlu1 }
 0x2ac   : > { %1802 = vmatmul.mubr.msk.bf16.vlgmr.msra.gmra.mrb[4].mxu0 %vm549_vm2, %v542_v31 }
 0x2ad   : > { %1836 = vmatpush3.bf16.msra.mxu0 %v1401_v32  ;;  %1837 = vmatprep.mubr.msk.bf16.mxu0 %vm2121_vm0, %v2120_v1 }
 0x2af   : > { %v543_v33 = vpop.trf.xlu1 }
 0x2b0   : > { %1805 = vmatprep.mubr.msk.bf16.mxu1 %vm549_vm2, %v543_v33 }
 0x2b3   : > { %v544_v35 = vpop.trf.xlu1 }
 0x2b4   : > { %1806 = vmatmul.mubr.msk.bf16.vlgmr.msra.gmra.mrb[0].mxu1 %vm549_vm2, %v544_v35  ;;  %1838 = vmatmul.mubr.msk.bf16.vlgmr.msra.gmra.mrb[8].mxu0 %vm549_vm2, %v1393_v34 }
 0x2b5   : > { %1818 = vmatpush3.bf16.msra.mxu1 %v980_v36 }
 0x2b7   : > { %v545_v37 = vpop.trf.xlu1 }
 0x2b8   : > { %1809 = vmatprep.mubr.msk.bf16.mxu1 %vm549_vm2, %v545_v37 }
 0x2bb   : > { %v546_v38 = vpop.trf.xlu1 }
 0x2bc   : > { %1810 = vmatmul.mubr.msk.bf16.gmra.mrb[4].mxu1 %vm549_vm2, %v546_v38 }
 0x2bf   : > { %v547_v39 = vpop.trf.xlu1 }
 0x2c0   : > { %1813 = vmatprep.mubr.msk.bf16.mxu1 %vm549_vm2, %v547_v39 }
 0x2c3   : > { %v548_v40 = vpop.trf.xlu1 }
 0x2c4   : > { %1814 = vmatmul.mubr.msk.bf16.gmra.mrb[8].mxu1 %vm549_vm2, %v548_v40 }
 0x2c5   : > { %1819 = vmatprep.mubr.msk.bf16.mxu1 %vm549_vm2, %v541_v29 }
 0x2cc   : > { %1820 = vmatmul.mubr.msk.bf16.vlgmr.msra.gmra.mrb[12].mxu1 %vm549_vm2, %v542_v31 }
 0x2cd   : > { %1823 = vmatprep.mubr.msk.bf16.mxu1 %vm549_vm2, %v543_v33 }
 0x2d4   : > { %1824 = vmatmul.mubr.msk.bf16.gmra.mrb[16].mxu1 %vm549_vm2, %v544_v35 }
 0x2d5   : > { %1827 = vmatprep.mubr.msk.bf16.mxu1 %vm549_vm2, %v545_v37 }
 0x2dc   : > { %1828 = vmatmul.mubr.msk.bf16.gmra.mrb[20].mxu1 %vm549_vm2, %v546_v38 }
 0x2dd   : > { %1831 = vmatprep.mubr.msk.bf16.mxu1 %vm549_vm2, %v547_v39 }
 0x2e4   : > { %1832 = vmatmul.mubr.msk.bf16.gmra.mrb[24].mxu1 %vm549_vm2, %v548_v40 }
 0x37f   : > { %v1803_v41 = vpop.f32.mrb[4].mxu0 }
 0x380   : > { %v693_v42 = vmin.f32 %v1803_v41, 0.0  ;;  %v612_v43 = vpop.f32.mrb[5].mxu0  ;;  %vm677_vm4 = vcmp.gt.f32.partialorder %v1803_v41, 0.0 }
 0x381   : > { %v691_v44 = vmin.f32 %v612_v43, 0.0  ;;  %v2325_v45 = vpop.f32.mrb[6].mxu0  ;;  %vm675_vm3 = vcmp.gt.f32.partialorder %v612_v43, 0.0 }
 0x382   : > { %v711_v46 = vmul.f32 1.442695, %v693_v42  ;;  %v694_v47 = vmin.f32 %v2325_v45, 0.0  ;;  %v2328_v48 = vpop.f32.mrb[7].mxu0  ;;  %vm678_vm5 = vcmp.gt.f32.partialorder %v2325_v45, 0.0 }
 0x383   : > { %v707_v49 = vmul.f32 1.442695, %v691_v44  ;;  %vm676_vm14 = vcmp.gt.f32.partialorder %v2328_v48, 0.0 }
 0x384   : > { %1932 = vpow2.f32 %v711_v46  ;;  %v713_v51 = vmul.f32 1.442695, %v694_v47 }
 0x385   : > { %1934 = vpow2.f32 %v707_v49 }
 0x386   : > { %1936 = vpow2.f32 %v713_v51  ;;  %v1324_v51 = vrot.slane %v2290_v27, 4 }
 0x387   : > { %v2330_v53 = vpop.f32.mrb[0].mxu1  ;;  %v1437_v54 = vpop.f32.mrb[8].mxu0 }
 0x388   : > { %v1445_v55 = vmul.f32 %v1444_v52, %v1437_v54  ;;  %v2332_v56 = vpop.f32.mrb[1].mxu1  ;;  %v1839_v57 = vpop.f32.mrb[9].mxu0  ;;  %vm681_vm0 = vcmp.gt.f32.partialorder %v2330_v53, 0.0 }
 0x389   : > { %v2334_v58 = vpop.f32.mrb[2].mxu1  ;;  %v1440_v59 = vpop.f32.mrb[10].mxu0  ;;  %vm679_vm15 = vcmp.gt.f32.partialorder %v2332_v56, 0.0 }
 0x38a   : > { %v1446_v60 = vrot.slane %v1445_v55, 4  ;;  %v698_v61 = vmin.f32 %v2334_v58, 0.0  ;;  %v2337_v62 = vpop.f32.mrb[3].mxu1  ;;  %v1840_v0 = vpop.f32.mrb[11].mxu0  ;;  %vm682_vm7 = vcmp.gt.f32.partialorder %v2334_v58, 0.0 }
 0x38b   : > { %v696_v63 = vmin.f32 %v2337_v62, 0.0  ;;  %vm680_vm6 = vcmp.gt.f32.partialorder %v2337_v62, 0.0 }
 0x38c   : > { %v1447_v2 = vadd.f32 %v1446_v60, %v1445_v55  ;;  %v721_v3 = vmul.f32 1.442695, %v698_v61 }
 0x38d   : > { %v717_v4 = vmul.f32 1.442695, %v696_v63 }
 0x38e   : > { %v1933_v5 = vpop.eup %1932  ;;  %v1448_v6 = vrot.slane %v1447_v2, 2  ;;  %1938 = vpow2.f32 %v721_v3 }
 0x38f   : > { %v1935_v7 = vpop.eup %1934  ;;  %1940 = vpow2.f32 %v717_v4  ;;  %v2340_v8 = vpop.f32.mrb[4].mxu1  ;;  %v1720_v9 = vadd.f32 -1.0, %v1933_v5 }
 0x390   : > { %v1937_v10 = vpop.eup %1936  ;;  %v1449_v11 = vadd.f32 %v1448_v6, %v1447_v2  ;;  %v2342_v12 = vpop.f32.mrb[5].mxu1  ;;  %v1718_v13 = vadd.f32 -1.0, %v1935_v7  ;;  %v1325_v2 = vadd.f32 %v1324_v51, %v2290_v27  ;;  %vm685_vm2 = vcmp.gt.f32.partialorder %v2340_v8, 0.0 }
 0x391   : > { %v2344_v14 = vpop.f32.mrb[6].mxu1  ;;  %v757_v22 = vmul.f32 1.6732632, %v1720_v9  ;;  %v1721_v23 = vadd.f32 -1.0, %v1937_v10  ;;  %vm683_vm1 = vcmp.gt.f32.partialorder %v2342_v12, 0.0 }
 0x392   : > { %v1450_v16 = vrot.slane %v1449_v11, 1  ;;  %v702_v18 = vmin.f32 %v2344_v14, 0.0  ;;  %v2347_v19 = vpop.f32.mrb[7].mxu1  ;;  %v755_v21 = vmul.f32 1.6732632, %v1718_v13  ;;  %vm686_vm9 = vcmp.gt.f32.partialorder %v2344_v14, 0.0 }
 0x393   : > { %v700_v20 = vmin.f32 %v2347_v19, 0.0  ;;  %v773_v32 = vsel %vm677_vm4, %v1803_v41, %v757_v22  ;;  %v758_v33 = vmul.f32 1.6732632, %v1721_v23  ;;  %vm684_vm8 = vcmp.gt.f32.partialorder %v2347_v19, 0.0 }
 0x394   : > { %v1451_v24 = vadd.f32 %v1450_v16, %v1449_v11  ;;  %v729_v25 = vmul.f32 1.442695, %v702_v18  ;;  %v771_v28 = vsel %vm675_vm3, %v612_v43, %v755_v21  ;;  %v2363_v40 = vmul.f32 1.050701, %v773_v32 }
 0x395   : > { %v725_v26 = vmul.f32 1.442695, %v700_v20  ;;  %v2350_v30 = vmul.f32 1.050701, %v771_v28  ;;  %v774_v43 = vsel %vm678_vm5, %v2325_v45, %v758_v33  ;;  %v1326_v11 = vrot.slane %v1325_v2, 2 }
 0x396   : > { %v1452_v29 = vadd.f32 %v1451_v24, %v1443_v15  ;;  %1942 = vpow2.f32 %v729_v25  ;;  %v2369_v50 = vmul.f32 1.050701, %v774_v43 }
 0x397   : > { %1944 = vpow2.f32 %v725_v26  ;;  %v2352_v31 = vpop.f32.mrb[8].mxu1  ;;  %803 = vmax.xlane.f32.xlu1 %v2350_v30 }
 0x398   : > { %v1939_v34 = vpop.eup %1938  ;;  %1453 = vst [vmem:[#allocation3] sm:$0x1] %v1452_v29  ;;  %v2355_v35 = vpop.f32.mrb[9].mxu1  ;;  %v1327_v29 = vadd.f32 %v1326_v11, %v1325_v2  ;;  %vm689_vm4 = vcmp.gt.f32.partialorder %v2352_v31, 0.0 }
 0x399   : > { %v1941_v36 = vpop.eup %1940  ;;  %v2357_v37 = vpop.f32.mrb[10].mxu1  ;;  %v1725_v44 = vadd.f32 -1.0, %v1939_v34  ;;  %vm687_vm3 = vcmp.gt.f32.partialorder %v2355_v35, 0.0 }
 0x39a   : > { %v706_v38 = vmin.f32 %v2357_v37, 0.0  ;;  %v2361_v39 = vpop.f32.mrb[11].mxu1  ;;  %v1723_v42 = vadd.f32 -1.0, %v1941_v36  ;;  %vm690_vm11 = vcmp.gt.f32.partialorder %v2357_v37, 0.0 }
 0x39b   : > { %v704_v41 = vmin.f32 %v2361_v39, 0.0  ;;  %807 = vmax.xlane.f32.xlu1 %v2363_v40  ;;  %v762_v55 = vmul.f32 1.6732632, %v1725_v44  ;;  %vm688_vm10 = vcmp.gt.f32.partialorder %v2361_v39, 0.0  ;;  %v1328_v44 = vrot.slane %v1327_v29, 1 }
 0x39c   : > { %v737_v46 = vmul.f32 1.442695, %v706_v38  ;;  %v760_v47 = vmul.f32 1.6732632, %v1723_v42 }
 0x39d   : > { %v733_v49 = vmul.f32 1.442695, %v704_v41  ;;  %v778_v4 = vsel %vm682_vm7, %v2334_v58, %v762_v55 }
 0x39e   : > { %1946 = vpow2.f32 %v737_v46  ;;  %v776_v54 = vsel %vm680_vm6, %v2337_v62, %v760_v47  ;;  %v2395_v10 = vmul.f32 1.050701, %v778_v4  ;;  %v1329_v4 = vadd.f32 %v1328_v44, %v1327_v29 }
 0x39f   : > { %1948 = vpow2.f32 %v733_v49  ;;  %v2372_v52 = vpop.f32.mrb[12].mxu1  ;;  %809 = vmax.xlane.f32.xlu1 %v2369_v50  ;;  %v2383_v63 = vmul.f32 1.050701, %v776_v54  ;;  %v695_v44 = vmin.f32 %v2332_v56, 0.0 }
 0x3a0   : > { %v1943_v45 = vpop.eup %1942  ;;  %v2376_v57 = vpop.f32.mrb[13].mxu1  ;;  %v1081_v7 = vmul.f32 %v2372_v52, %v2372_v52 }
 0x3a1   : > { %v1945_v59 = vpop.eup %1944  ;;  %v2378_v60 = vpop.f32.mrb[14].mxu1  ;;  %v1079_v62 = vmul.f32 %v2376_v57, %v2376_v57  ;;  %v1729_v5 = vadd.f32 -1.0, %v1943_v45 }
 0x3a2   : > { %v2381_v61 = vpop.f32.mrb[15].mxu1  ;;  %v1727_v0 = vadd.f32 -1.0, %v1945_v59  ;;  %v1082_v13 = vmul.f32 %v2378_v60, %v2378_v60 }
 0x3a3   : > { %v1080_v3 = vmul.f32 %v2381_v61, %v2381_v61  ;;  %813 = vmax.xlane.f32.xlu1 %v2383_v63  ;;  %v766_v18 = vmul.f32 1.6732632, %v1729_v5 }
 0x3a4   : > { %v764_v6 = vmul.f32 1.6732632, %v1727_v0 }
 0x3a5   : > { %v1095_v9 = vadd.f32 %v1080_v3, %v1079_v62  ;;  %v782_v34 = vsel %vm686_vm9, %v2344_v14, %v766_v18 }
 0x3a6   : > { %v780_v58 = vsel %vm684_vm8, %v2347_v19, %v764_v6  ;;  %v2421_v43 = vmul.f32 1.050701, %v782_v34 }
 0x3a7   : > { %v1096_v15 = vadd.f32 %v1095_v9, %v1081_v7  ;;  %v2399_v16 = vpop.f32.mrb[16].mxu1  ;;  %817 = vmax.xlane.f32.xlu1 %v2395_v10  ;;  %v2412_v28 = vmul.f32 1.050701, %v780_v58 }
 0x3a8   : > { %v1947_v20 = vpop.eup %1946  ;;  %v2403_v21 = vpop.f32.mrb[17].mxu1  ;;  %v1085_v42 = vmul.f32 %v2399_v16, %v2399_v16 }
 0x3a9   : > { %v1949_v22 = vpop.eup %1948  ;;  %v1083_v23 = vmul.f32 %v2403_v21, %v2403_v21  ;;  %v1097_v24 = vadd.f32 %v1096_v15, %v1082_v13  ;;  %v2407_v25 = vpop.f32.mrb[18].mxu1  ;;  %v1733_v36 = vadd.f32 -1.0, %v1947_v20  ;;  %v1330_v15 = vmul.f32 %v1329_v4, %v1329_v4 }
 0x3aa   : > { %v2410_v26 = vpop.f32.mrb[19].mxu1  ;;  %v1731_v19 = vadd.f32 -1.0, %v1949_v22  ;;  %v1086_v46 = vmul.f32 %v2407_v25, %v2407_v25  ;;  %v703_v4 = vmin.f32 %v2355_v35, 0.0 }
 0x3ab   : > { %v1098_v32 = vadd.f32 %v1097_v24, %v1083_v23  ;;  %v1084_v33 = vmul.f32 %v2410_v26, %v2410_v26  ;;  %821 = vmax.xlane.f32.xlu1 %v2412_v28  ;;  %v770_v51 = vmul.f32 1.6732632, %v1733_v36 }
 0x3ac   : > { %v768_v38 = vmul.f32 1.6732632, %v1731_v19  ;;  %v1332_v19 = vsel %vm1331_vm12, %v1330_v15, 0.0 }
 0x3ad   : > { %v1099_v41 = vadd.f32 %v1098_v32, %v1084_v33  ;;  %v786_v3 = vsel %vm690_vm11, %v2357_v37, %v770_v51  ;;  %v699_v51 = vmin.f32 %v2342_v12, 0.0 }
 0x3ae   : > { %v784_v14 = vsel %vm688_vm10, %v2361_v39, %v768_v38  ;;  %v2446_v7 = vmul.f32 1.050701, %v786_v3  ;;  %v692_v38 = vmin.f32 %v2328_v48, 0.0 }
 0x3af   : > { %v1100_v47 = vadd.f32 %v1099_v41, %v1085_v42  ;;  %v2425_v49 = vpop.f32.mrb[20].mxu1  ;;  %825 = vmax.xlane.f32.xlu1 %v2421_v43  ;;  %v2438_v2 = vmul.f32 1.050701, %v784_v14  ;;  %v403_v42 = vld [vmem:[%s387_s21] sm:$0xff] }
 0x3b0   : > { %v2429_v54 = vpop.f32.mrb[21].mxu1  ;;  %v1089_v5 = vmul.f32 %v2425_v49, %v2425_v49  ;;  %v709_v41 = vmul.f32 1.442695, %v692_v38 }
 0x3b1   : > { %v1087_v55 = vmul.f32 %v2429_v54, %v2429_v54  ;;  %v1101_v45 = vadd.f32 %v1100_v47, %v1086_v46  ;;  %v2433_v59 = vpop.f32.mrb[22].mxu1  ;;  %v697_v46 = vmin.f32 %v2330_v53, 0.0  ;;  %v715_v47 = vmul.f32 1.442695, %v695_v44 }
 0x3b2   : > { %v2436_v0 = vpop.f32.mrb[23].mxu1  ;;  %v1090_v9 = vmul.f32 %v2433_v59, %v2433_v59  ;;  %1950 = vpow2.f32 %v709_v41 }
 0x3b3   : > { %v1102_v62 = vadd.f32 %v1101_v45, %v1087_v55  ;;  %v1088_v39 = vmul.f32 %v2436_v0, %v2436_v0  ;;  %829 = vmax.xlane.f32.xlu1 %v2438_v2  ;;  %v719_v14 = vmul.f32 1.442695, %v697_v46  ;;  %1952 = vpow2.f32 %v715_v47 }
 0x3b4   : > { %v701_v55 = vmin.f32 %v2340_v8, 0.0  ;;  %v723_v45 = vmul.f32 1.442695, %v699_v51 }
 0x3b5   : > { %v1103_v6 = vadd.f32 %v1102_v62, %v1088_v39  ;;  %1954 = vpow2.f32 %v719_v14  ;;  %v1459_v39 = vsel %vm1350_vm13, %v403_v42, 0.0 }
 0x3b6   : > { %v727_v3 = vmul.f32 1.442695, %v701_v55  ;;  %1956 = vpow2.f32 %v723_v45 }
 0x3b7   : > { %v1104_v11 = vadd.f32 %v1103_v6, %v1089_v5  ;;  %v2450_v13 = vpop.f32.mrb[24].mxu1  ;;  %833 = vmax.xlane.f32.xlu1 %v2446_v7 }
 0x3b8   : > { %v2453_v58 = vpop.f32.mrb[25].mxu1  ;;  %v1093_v29 = vmul.f32 %v2450_v13, %v2450_v13  ;;  %1958 = vpow2.f32 %v727_v3 }
 0x3b9   : > { %v1091_v37 = vmul.f32 %v2453_v58, %v2453_v58  ;;  %v1105_v18 = vadd.f32 %v1104_v11, %v1090_v9  ;;  %v2457_v20 = vpop.f32.mrb[26].mxu1  ;;  %v705_v9 = vmin.f32 %v2352_v31, 0.0  ;;  %v731_v11 = vmul.f32 1.442695, %v703_v4 }
 0x3ba   : > { %v2459_v22 = vpop.f32.mrb[27].mxu1  ;;  %v1094_v33 = vmul.f32 %v2457_v20, %v2457_v20 }
 0x3bb   : > { %v1106_v23 = vadd.f32 %v1105_v18, %v1091_v37  ;;  %v1092_v24 = vmul.f32 %v2459_v22, %v2459_v22  ;;  %1333 = vadd.xlane.f32.xlu1 %v1332_v19  ;;  %1960 = vpow2.f32 %v731_v11 }
 0x3bc   : > { %v1951_v62 = vpop.eup %1950 }
 0x3bd   : > { %v1107_v32 = vadd.f32 %v1106_v23, %v1092_v24  ;;  %v1719_v5 = vadd.f32 -1.0, %v1951_v62  ;;  %v1953_v6 = vpop.eup %1952  ;;  %v735_v23 = vmul.f32 1.442695, %v705_v9 }
 0x3be   : > { %v1722_v37 = vadd.f32 -1.0, %v1953_v6 }
 0x3bf   : > { %v1108_v34 = vadd.f32 %v1107_v32, %v1093_v29  ;;  %1460 = vadd.xlane.f32.xlu1 %v1459_v39  ;;  %v756_v15 = vmul.f32 1.6732632, %v1719_v5  ;;  %v1955_v18 = vpop.eup %1954  ;;  %1962 = vpow2.f32 %v735_v23 }
 0x3c0   : > { %v759_v19 = vmul.f32 1.6732632, %v1722_v37  ;;  %v1724_v29 = vadd.f32 -1.0, %v1955_v18  ;;  %v1957_v32 = vpop.eup %1956 }
 0x3c1   : > { %v1109_v36 = vadd.f32 %v1108_v34, %v1094_v33  ;;  %v772_v24 = vsel %vm676_vm14, %v2328_v48, %v756_v15  ;;  %v1726_v38 = vadd.f32 -1.0, %v1957_v32 }
 0x3c2   : > { %v2484_v33 = vmul.f32 1.050701, %v772_v24  ;;  %v775_v34 = vsel %vm679_vm15, %v2332_v56, %v759_v19 }
 0x3c3   : > { %1110 = vadd.xlane.f32.xlu0 %v1109_v36  ;;  %v761_v36 = vmul.f32 1.6732632, %v1724_v29  ;;  %v2489_v41 = vmul.f32 1.050701, %v775_v34  ;;  %v763_v44 = vmul.f32 1.6732632, %v1726_v38 }
 0x3c5   : > { %v777_v48 = vsel %vm681_vm0, %v2330_v53, %v761_v36  ;;  %v779_v56 = vsel %vm683_vm1, %v2342_v12, %v763_v44 }
 0x3c6   : > { %v2494_v14 = vmul.f32 1.050701, %v777_v48  ;;  %v2499_v62 = vmul.f32 1.050701, %v779_v56 }
 0x3d9   : > { %1375 = vperm.xlu0 %1919, %v403_v42   ;;  %v1959_v42 = vpop.eup %1958 }
 0x3da   : > { %v1728_v46 = vadd.f32 -1.0, %v1959_v42  ;;  %v1961_v47 = vpop.eup %1960 }
 0x3db   : > { %v1730_v55 = vadd.f32 -1.0, %v1961_v47  ;;  %v1963_v45 = vpop.eup %1962 }
 0x3dc   : > { %v765_v51 = vmul.f32 1.6732632, %v1728_v46  ;;  %v1732_v3 = vadd.f32 -1.0, %v1963_v45 }
 0x3dd   : > { %v767_v39 = vmul.f32 1.6732632, %v1730_v55 }
 0x3de   : > { %v781_v53 = vsel %vm685_vm2, %v2340_v8, %v765_v51  ;;  %v769_v5 = vmul.f32 1.6732632, %v1732_v3 }
 0x3df   : > { %v2504_v4 = vmul.f32 1.050701, %v781_v53  ;;  %v783_v12 = vsel %vm687_vm3, %v2355_v35, %v767_v39 }
 0x3e0   : > { %v2509_v6 = vmul.f32 1.050701, %v783_v12  ;;  %v785_v9 = vsel %vm689_vm4, %v2352_v31, %v769_v5 }
 0x3e1   : > { %v2513_v8 = vmul.f32 1.050701, %v785_v9 }
 0x3f8   : > { %805 = vmax.xlane.f32.xlu0 %v2484_v33 }
 0x3fc   : > { %811 = vmax.xlane.f32.xlu0 %v2489_v41 }
 0x400   : > { %815 = vmax.xlane.f32.xlu0 %v2494_v14 }
 0x404   : > { %819 = vmax.xlane.f32.xlu0 %v2499_v62 }
 0x408   : > { %823 = vmax.xlane.f32.xlu0 %v2504_v4 }
 0x40c   : > { %827 = vmax.xlane.f32.xlu0 %v2509_v6 }
 0x410   : > { %831 = vmax.xlane.f32.xlu0 %v2513_v8 }
 0x424   : > { %v2517_v48 = vpop.xlane.xlu1 %803 }
 0x428   : > { %v2519_v47 = vpop.xlane.xlu1 %807 }
 0x450   : > { %v1111_v11 = vpop.xlane.xlu0 %1110 }
 0x451   : > { %v1112_v15 = vrot.slane %v1111_v11, 4 }
 0x453   : > { %v1113_v37 = vadd.f32 %v1112_v15, %v1111_v11 }
 0x455   : > { %v1114_v18 = vrot.slane %v1113_v37, 2 }
 0x457   : > { %v1115_v35 = vadd.f32 %v1114_v18, %v1113_v37 }
 0x458   : > { %v1376_v23 = vpop.permute.xlu0 %1375 }
 0x459   : > { %v1378_v24 = vmul.f32 %v1376_v23, %v2290_v27  ;;  %v1116_v19 = vrot.slane %v1115_v35, 1  ;;  %v810_v27 = vpop.xlane.xlu1 %809 }
 0x45a   : > { %v2523_v53 = vsub.f32 %v2369_v50, %v810_v27 }
 0x45b   : > { %v1379_v29 = vrot.slane %v1378_v24, 4  ;;  %v1117_v32 = vadd.f32 %v1116_v19, %v1115_v35 }
 0x45c   : > { %v857_v5 = vmul.f32 1.442695, %v2523_v53 }
 0x45d   : > { %v1380_v34 = vadd.f32 %v1379_v29, %v1378_v24  ;;  %1846 = vpush %v1117_v32  ;;  %v814_v51 = vpop.xlane.xlu1 %813 }
 0x45e   : > { %v2531_v9 = vsub.f32 %v2383_v63, %v814_v51 }
 0x45f   : > { %v1381_v31 = vrot.slane %v1380_v34, 2 }
 0x460   : > { %v861_v11 = vmul.f32 1.442695, %v2531_v9 }
 0x461   : > { %v1382_v36 = vadd.f32 %v1381_v31, %v1380_v34  ;;  %v818_v55 = vpop.xlane.xlu1 %817 }
 0x462   : > { %v2535_v15 = vsub.f32 %v2395_v10, %v818_v55 }
 0x463   : > { %v1383_v38 = vrot.slane %v1382_v36, 1 }
 0x465   : > { %v1384_v42 = vadd.f32 %v1383_v38, %v1382_v36  ;;  %v822_v12 = vpop.xlane.xlu1 %821 }
 0x466   : > { %v2539_v18 = vsub.f32 %v2412_v28, %v822_v12 }
 0x467   : > { %1385 = vst [vmem:[#allocation4] sm:$0x1] %v1384_v42  ;;  %v1127_v42 = vlaneseq }
 0x468   : > { %v869_v23 = vmul.f32 1.442695, %v2539_v18 }
 0x469   : > { %v826_v50 = vpop.xlane.xlu1 %825  ;;  %v1128_v51 = vshrl.u32 %v1127_v42, 7  ;;  %v2554_v55 = vand.u32 127, %v1127_v42 }
 0x46a   : > { %v2543_v24 = vsub.f32 %v2421_v43, %v826_v50 }
 0x46b   : > { %vm1146_vm7 = vcmp.eq.s32.totalorder %v1128_v51, %v2554_v55 }
 0x46c   : > { %v873_v29 = vmul.f32 1.442695, %v2543_v24 }
 0x46d   : > { %v830_v63 = vpop.xlane.xlu1 %829 }
 0x46e   : > { %v1471_v44 = vld [vmem:[#allocation4] sm:$0x1]  ;;  %v2547_v32 = vsub.f32 %v2438_v2, %v830_v63 }
 0x46f   : > { %v1485_v46 = vmul.f32 %v1471_v44, %v1471_v44 }
 0x470   : > { %v877_v43 = vmul.f32 1.442695, %v2547_v32 }
 0x471   : > { %v1486_v56 = vsel %vm1331_vm12, %v1485_v46, 0.0  ;;  %v834_v28 = vpop.xlane.xlu1 %833 }
 0x472   : > { %1487 = vadd.xlane.f32.xlu1 %v1486_v56  ;;  %v2551_v44 = vsub.f32 %v2446_v7, %v834_v28  ;;  %v1742_v7 = vsel %vm1146_vm7, 1.0, %v2120_v1 }
 0x473   : > { %v1244_v50 = vmul.f32 0.35355338, %v1742_v7 }
 0x474   : > { %v881_v2 = vmul.f32 1.442695, %v2551_v44 }
 0x485   : > { %v806_v45 = vpop.xlane.xlu0 %805 }
 0x486   : > { %v2526_v39 = vsub.f32 %v2484_v33, %v806_v45  ;;  %v865_v33 = vmul.f32 1.442695, %v2535_v15 }
 0x488   : > { %v853_v3 = vmul.f32 1.442695, %v2526_v39 }
 0x48a   : > { %1964 = vpow2.f32 %v853_v3 }
 0x48b   : > { %1966 = vpow2.f32 %v857_v5 }
 0x48e   : > { %s1847_s16 = spop %1846 }
 0x48f   : > { %v1119_v37 = vstv %s1847_s16  ;;  %s2638_s16 = scalar_lea.hbm %s2729_s6, %s1746_s22  ;;  %s2044_s22 = sshll.u32 %s2123_s12, 4  ;;  %s2045_s22 = int_to_ptr.vmem [resolvable:$false] %s2044_s22 }
 0x490   : > { %1968 = vrsqrt.f32 %v1119_v37  ;;  %vm1122_vm5 = vcmp.eq.f32.partialorder %v1119_v37, inf  ;;  %v1125_v36 = vand.u32 2147483648, %v1119_v37  ;;  %vm1124_vm6 = vcmp.eq.f32.partialorder %v1119_v37, 0.0  ;;  %s2046_s25 = scalar_lea.vmem %s2045_s22, 256  ;;  %p2047_p1 = scmp.lt.s32.totalorder %s2642_s23, %s2045_s22 }
 0x491   : > { %1970 = vpow2.f32 %v861_v11  ;;  %p2048_p2 = scmp.lt.s32.totalorder %s2046_s25, %s2040_s30 }
 0x492   : > { %1972 = vpow2.f32 %v865_v33 }
 0x493   : > { %1974 = vpow2.f32 %v869_v23  ;;  %p2049_p3 = por %p2048_p2, %p2047_p1 }
 0x494   : > { %v1965_v35 = vpop.eup %1964  ;;  %1976 = vpow2.f32 %v873_v29 }
 0x495   : > { %885 = vadd.xlane.f32.xlu1 %v1965_v35  ;;  %v1967_v10 = vpop.eup %1966  ;;  %p2050_p5 = pnand %p2049_p3, %p2043_p0 }
 0x499   : > { %889 = vadd.xlane.f32.xlu1 %v1967_v10 }
 0x49a   : > { %v1969_v19 = vpop.eup %1968 }
 0x49b   : > { %v1121_v34 = vmul.f32 %v1969_v19, %v1119_v37  ;;  %v1971_v31 = vpop.eup %1970 }
 0x49c   : > { %v1973_v27 = vpop.eup %1972 }
 0x49d   : > { %v1123_v38 = vsel %vm1122_vm5, %v1119_v37, %v1121_v34  ;;  %893 = vadd.xlane.f32.xlu1 %v1971_v31  ;;  %v1975_v45 = vpop.eup %1974 }
 0x49e   : > { %v1126_v46 = vsel %vm1124_vm6, %v1125_v36, %v1123_v38  ;;  %v1977_v3 = vpop.eup %1976 }
 0x49f   : > { %v1226_v56 = vmax.f32 %v1126_v46, 1e-20 }
 0x4a1   : > { %1978 = vrcp.f32 %v1226_v56  ;;  %897 = vadd.xlane.f32.xlu1 %v1973_v27 }
 0x4a2   : > { %1980 = vpow2.f32 %v877_v43 }
 0x4a3   : > { %1982 = vpow2.f32 %v881_v2 }
 0x4a5   : > { %901 = vadd.xlane.f32.xlu1 %v1975_v45 }
 0x4a9   : > { %905 = vadd.xlane.f32.xlu1 %v1977_v3 }
 0x4ab   : > { %v1979_v12 = vpop.eup %1978 }
 0x4ac   : > { %v1981_v5 = vpop.eup %1980  ;;  %v1228_v11 = vmul.f32 %v1979_v12, %v2376_v57  ;;  %v1229_v37 = vmul.f32 %v1979_v12, %v2381_v61  ;;  %v1230_v35 = vmul.f32 %v1979_v12, %v2372_v52  ;;  %v1231_v23 = vmul.f32 %v1979_v12, %v2378_v60 }
 0x4ad   : > { %909 = vadd.xlane.f32.xlu1 %v1981_v5  ;;  %v1983_v33 = vpop.eup %1982  ;;  %v1232_v29 = vmul.f32 %v1979_v12, %v2403_v21  ;;  %v1233_v34 = vmul.f32 %v1979_v12, %v2410_v26  ;;  %v1234_v36 = vmul.f32 %v1979_v12, %v2399_v16  ;;  %v1235_v52 = vmul.f32 %v1979_v12, %v2407_v25 }
 0x4ae   : > { %v1260_v63 = vsub.f32 %v1228_v11, %v1244_v50  ;;  %v1277_v19 = vmul.f32 %v1229_v37, %v1229_v37  ;;  %v1278_v1 = vmul.f32 %v1230_v35, %v1230_v35  ;;  %v1279_v57 = vmul.f32 %v1231_v23, %v1231_v23  ;;  %v812_v50 = vpop.xlane.xlu0 %811 }
 0x4af   : > { %v1280_v61 = vmul.f32 %v1232_v29, %v1232_v29  ;;  %v1281_v42 = vmul.f32 %v1233_v34, %v1233_v34  ;;  %v1236_v60 = vmul.f32 %v1979_v12, %v2429_v54  ;;  %v1282_v46 = vmul.f32 %v1234_v36, %v1234_v36 }
 0x4b0   : > { %v1276_v10 = vmul.f32 %v1260_v63, %v1260_v63  ;;  %v1237_v21 = vmul.f32 %v1979_v12, %v2436_v0  ;;  %v1283_v27 = vmul.f32 %v1235_v52, %v1235_v52  ;;  %v1238_v26 = vmul.f32 %v1979_v12, %v2425_v49 }
 0x4b1   : > { %913 = vadd.xlane.f32.xlu1 %v1983_v33  ;;  %v1284_v51 = vmul.f32 %v1236_v60, %v1236_v60  ;;  %v1239_v16 = vmul.f32 %v1979_v12, %v2433_v59  ;;  %v1240_v25 = vmul.f32 %v1979_v12, %v2453_v58  ;;  %v1241_v54 = vmul.f32 %v1979_v12, %v2459_v22 }
 0x4b2   : > { %v1292_v28 = vadd.f32 %v1277_v19, %v1276_v10  ;;  %v1285_v3 = vmul.f32 %v1237_v21, %v1237_v21  ;;  %v1286_v5 = vmul.f32 %v1238_v26, %v1238_v26  ;;  %v1242_v0 = vmul.f32 %v1979_v12, %v2450_v13  ;;  %v816_v58 = vpop.xlane.xlu0 %815 }
 0x4b3   : > { %v1287_v37 = vmul.f32 %v1239_v16, %v1239_v16  ;;  %v1288_v35 = vmul.f32 %v1240_v25, %v1240_v25  ;;  %v1243_v49 = vmul.f32 %v1979_v12, %v2457_v20  ;;  %v1289_v23 = vmul.f32 %v1241_v54, %v1241_v54  ;;  %v1472_v12 = vld [vmem:[#allocation3] sm:$0x1] }
 0x4b4   : > { %v1293_v31 = vadd.f32 %v1292_v28, %v1278_v1  ;;  %v2576_v59 = vsub.f32 %v2350_v30, %v2517_v48  ;;  %v1290_v19 = vmul.f32 %v1242_v0, %v1242_v0  ;;  %v2581_v13 = vsub.f32 %v2363_v40, %v2519_v47 }
 0x4b5   : > { %v1291_v1 = vmul.f32 %v1243_v49, %v1243_v49  ;;  %v2585_v30 = vsub.f32 %v2489_v41, %v812_v50  ;;  %v1351_v48 = vsel %vm1350_vm13, %v2278_v17, 0.0  ;;  %v2591_v40 = vsub.f32 %v2494_v14, %v816_v58 }
 0x4b6   : > { %v1294_v38 = vadd.f32 %v1293_v31, %v1279_v57  ;;  %v851_v22 = vmul.f32 1.442695, %v2576_v59  ;;  %v820_v57 = vpop.xlane.xlu0 %819  ;;  %v855_v20 = vmul.f32 1.442695, %v2581_v13  ;;  %v1474_v36 = vsel %vm1331_vm12, %v1472_v12, 0.0 }
 0x4b7   : > { %v859_v31 = vmul.f32 1.442695, %v2585_v30  ;;  %v2596_v41 = vsub.f32 %v2499_v62, %v820_v57 }
 0x4b8   : > { %v1295_v43 = vadd.f32 %v1294_v38, %v1280_v61  ;;  %1984 = vpow2.f32 %v851_v22  ;;  %v863_v61 = vmul.f32 1.442695, %v2591_v40 }
 0x4b9   : > { %1986 = vpow2.f32 %v855_v20  ;;  %v867_v52 = vmul.f32 1.442695, %v2596_v41 }
 0x4ba   : > { %v1296_v56 = vadd.f32 %v1295_v43, %v1281_v42  ;;  %v824_v47 = vpop.xlane.xlu0 %823  ;;  %1988 = vpow2.f32 %v859_v31 }
 0x4bb   : > { %1990 = vpow2.f32 %v863_v61  ;;  %v2600_v42 = vsub.f32 %v2504_v4, %v824_v47 }
 0x4bc   : > { %v1297_v2 = vadd.f32 %v1296_v56, %v1282_v46  ;;  %1992 = vpow2.f32 %v867_v52 }
 0x4bd   : > { %v871_v43 = vmul.f32 1.442695, %v2600_v42 }
 0x4be   : > { %v1298_v45 = vadd.f32 %v1297_v2, %v1283_v27  ;;  %v828_v17 = vpop.xlane.xlu0 %827 }
 0x4bf   : > { %v2604_v60 = vsub.f32 %v2509_v6, %v828_v17  ;;  %1994 = vpow2.f32 %v871_v43 }
 0x4c0   : > { %v1299_v7 = vadd.f32 %v1298_v45, %v1284_v51  ;;  %v2611_v45 = vpop.xlane.xlu1 %1333 }
 0x4c1   : > { %v875_v56 = vmul.f32 1.442695, %v2604_v60 }
 0x4c2   : > { %v1300_v11 = vadd.f32 %v1299_v7, %v1285_v3  ;;  %v1985_v38 = vpop.eup %1984  ;;  %v832_v46 = vpop.xlane.xlu0 %831 }
 0x4c3   : > { %v1987_v14 = vpop.eup %1986  ;;  %v2608_v21 = vsub.f32 %v2513_v8, %v832_v46  ;;  %1996 = vpow2.f32 %v875_v56 }
 0x4c4   : > { %v1301_v33 = vadd.f32 %v1300_v11, %v1286_v5  ;;  %v1989_v62 = vpop.eup %1988  ;;  %v2613_v16 = vpop.xlane.xlu1 %1460 }
 0x4c5   : > { %v1991_v27 = vpop.eup %1990  ;;  %v879_v4 = vmul.f32 1.442695, %v2608_v21 }
 0x4c6   : > { %v1302_v63 = vadd.f32 %v1301_v33, %v1287_v37  ;;  %v1993_v2 = vpop.eup %1992 }
 0x4c7   : > { %1998 = vpow2.f32 %v879_v4 }
 0x4c8   : > { %v1303_v10 = vadd.f32 %v1302_v63, %v1288_v35 }
 0x4c9   : > { %v1995_v6 = vpop.eup %1994 }
 0x4ca   : > { %v1304_v29 = vadd.f32 %v1303_v10, %v1289_v23 }
 0x4cc   : > { %v1305_v28 = vadd.f32 %v1304_v29, %v1290_v19 }
 0x4cd   : > { %v1997_v26 = vpop.eup %1996 }
 0x4ce   : > { %v1306_v34 = vadd.f32 %v1305_v28, %v1291_v1 }
 0x4d0   : > { %1307 = vadd.xlane.f32.xlu0 %v1306_v34 }
 0x4d1   : > { %v1999_v51 = vpop.eup %1998 }
 0x4d4   : > { %1352 = vadd.xlane.f32.xlu0 %v1351_v48 }
 0x4d8   : > { %1475 = vadd.xlane.f32.xlu0 %v1474_v36 }
 0x4dc   : > { %883 = vadd.xlane.f32.xlu0 %v1985_v38 }
 0x4e0   : > { %887 = vadd.xlane.f32.xlu0 %v1987_v14 }
 0x4e4   : > { %891 = vadd.xlane.f32.xlu0 %v1989_v62 }
 0x4e8   : > { %895 = vadd.xlane.f32.xlu0 %v1991_v27 }
 0x4ec   : > { %899 = vadd.xlane.f32.xlu0 %v1993_v2 }
 0x4f0   : > { %903 = vadd.xlane.f32.xlu0 %v1995_v6 }
 0x4f4   : > { %907 = vadd.xlane.f32.xlu0 %v1997_v26 }
 0x4f8   : > { %911 = vadd.xlane.f32.xlu0 %v1999_v51 }
 0x4ff   : > { %v2615_v8 = vpop.xlane.xlu1 %1487 }
 0x522   : > { %v886_v3 = vpop.xlane.xlu1 %885 }
 0x523   : > { %2000 = vlog2.f32 %v886_v3 }
 0x526   : > { %v890_v7 = vpop.xlane.xlu1 %889 }
 0x527   : > { %2002 = vlog2.f32 %v890_v7 }
 0x52a   : > { %v894_v25 = vpop.xlane.xlu1 %893 }
 0x52b   : > { %2004 = vlog2.f32 %v894_v25 }
 0x52d   : > { %v2001_v5 = vpop.eup %2000 }
 0x52e   : > { %v918_v11 = vmul.f32 0.6931472, %v2001_v5  ;;  %v898_v50 = vpop.xlane.xlu1 %897 }
 0x52f   : > { %2006 = vlog2.f32 %v898_v50 }
 0x530   : > { %v948_v54 = vsub.f32 %v2526_v39, %v918_v11 }
 0x531   : > { %v2003_v37 = vpop.eup %2002 }
 0x532   : > { %964 = vst [vmem:[%s2621_s14 + $0x8] sm:$0xff] %v948_v54  ;;  %v922_v33 = vmul.f32 0.6931472, %v2003_v37  ;;  %v902_v0 = vpop.xlane.xlu1 %901 }
 0x533   : > { %2008 = vlog2.f32 %v902_v0 }
 0x534   : > { %v950_v35 = vsub.f32 %v2523_v53, %v922_v33 }
 0x535   : > { %v2005_v63 = vpop.eup %2004 }
 0x536   : > { %966 = vst [vmem:[%s2621_s14 + $0x18] sm:$0xff] %v950_v35  ;;  %v926_v49 = vmul.f32 0.6931472, %v2005_v63  ;;  %v906_v23 = vpop.xlane.xlu1 %905 }
 0x537   : > { %2010 = vlog2.f32 %v906_v23 }
 0x538   : > { %v952_v10 = vsub.f32 %v2531_v9, %v926_v49 }
 0x539   : > { %v2007_v58 = vpop.eup %2006 }
 0x53a   : > { %968 = vst [vmem:[%s2621_s14 + $0x28] sm:$0xff] %v952_v10  ;;  %v930_v39 = vmul.f32 0.6931472, %v2007_v58  ;;  %v910_v19 = vpop.xlane.xlu1 %909 }
 0x53b   : > { %2012 = vlog2.f32 %v910_v19 }
 0x53c   : > { %v954_v29 = vsub.f32 %v2535_v15, %v930_v39 }
 0x53d   : > { %v2009_v1 = vpop.eup %2008 }
 0x53e   : > { %970 = vst [vmem:[%s2621_s14 + $0x38] sm:$0xff] %v954_v29  ;;  %v934_v53 = vmul.f32 0.6931472, %v2009_v1  ;;  %v914_v28 = vpop.xlane.xlu1 %913 }
 0x53f   : > { %2014 = vlog2.f32 %v914_v28 }
 0x540   : > { %v956_v22 = vsub.f32 %v2539_v18, %v934_v53 }
 0x541   : > { %v2011_v9 = vpop.eup %2010 }
 0x542   : > { %972 = vst [vmem:[%s2621_s14 + $0x48] sm:$0xff] %v956_v22  ;;  %v938_v34 = vmul.f32 0.6931472, %v2011_v9 }
 0x544   : > { %v958_v57 = vsub.f32 %v2543_v24, %v938_v34 }
 0x545   : > { %v2013_v15 = vpop.eup %2012 }
 0x546   : > { %974 = vst [vmem:[%s2621_s14 + $0x58] sm:$0xff] %v958_v57  ;;  %v942_v18 = vmul.f32 0.6931472, %v2013_v15 }
 0x547   : > { %2053 = shalt.err (!%p2050_p5)
}
 0x548   : > { %s2054_s24 = scalar_lea.hbm %s2638_s16, 128  ;;  %s2058_s21 = scalar_lea.hbm %s2729_s6, 256 }
 0x549   : > { %p2055_p6 = scmp.ne.s32.totalorder %s2638_s16, %s2054_s24  ;;  %p2059_p10 = scmp.lt.u32.totalorder %s2638_s16, %s2729_s6 }
 0x54a   : > { %p2060_p11 = scmp.lt.u32.totalorder %s2058_s21, %s2054_s24  ;;  %p2062_p13 = scmp.lt.u32.totalorder %s2054_s24, %s2638_s16 }
 0x54b   : > { %p2056_p7 = pnand %p2055_p6, %p2209_p4 }
 0x54c   : > { %p2061_p12 = por %p2060_p11, %p2059_p10 }
 0x54d   : > { %p2057_p9 = pneg %p2056_p7 }
 0x54e   : > { %p2063_p0 = por %p2062_p13, %p2061_p12 }
 0x550   : > { %p2064_p1 = pnand %p2063_p0, %p2057_p9 }
 0x552   : > { %2067 = shalt.err (!%p2064_p1)
}
 0x553   : > { %1860 = dma.vmem_to_hbm [thread:$0]  (%p2209_p4), %s2642_s23, 128, %s2638_s16, %s1510_s11   ;;  %v960_v24 = vsub.f32 %v2547_v32, %v942_v18  ;;  %v2015_v20 = vpop.eup %2014  ;;  %v1335_v31 = vrot.slane %v2611_v45, 4  ;;  %v1462_v47 = vrot.slane %v2613_v16, 4  ;;  %v1489_v17 = vrot.slane %v2615_v8, 4 }
 0x554   : > { %v946_v48 = vmul.f32 0.6931472, %v2015_v20  ;;  %vm1367_vm12 = vcmp.eq.s32.totalorder %v2554_v55, 1  ;;  %vm1369_vm13 = vcmp.eq.s32.totalorder %v2554_v55, 2  ;;  %s395_s26 = scalar_lea.vmem %s2731_s8, %s2253_s19  ;;  %vm1505_vm14 = vcmp.eq.s32.totalorder %v2554_v55, 0 }
 0x555   : > { %976 = vst [vmem:[%s2621_s14 + $0x68] sm:$0xff] %v960_v24  ;;  %v1336_v36 = vadd.f32 %v1335_v31, %v2611_v45  ;;  %v1463_v61 = vadd.f32 %v1462_v47, %v2613_v16  ;;  %v1490_v46 = vadd.f32 %v1489_v17, %v2615_v8 }
 0x556   : > { %v962_v12 = vsub.f32 %v2551_v44, %v946_v48 }
 0x557   : > { %v1337_v38 = vrot.slane %v1336_v36, 2  ;;  %v1464_v32 = vrot.slane %v1463_v61, 2  ;;  %v1491_v26 = vrot.slane %v1490_v46, 2 }
 0x558   : > { %978 = vst [vmem:[%s2621_s14 + $0x78] sm:$0xff] %v962_v12 }
 0x559   : > { %v1338_v44 = vadd.f32 %v1337_v38, %v1336_v36  ;;  %v1465_v4 = vadd.f32 %v1464_v32, %v1463_v61  ;;  %v1492_v8 = vadd.f32 %v1491_v26, %v1490_v46 }
 0x55b   : > { %v1339_v45 = vrot.slane %v1338_v44, 1  ;;  %v1466_v25 = vrot.slane %v1465_v4, 1  ;;  %v1493_v10 = vrot.slane %v1492_v8, 1 }
 0x55d   : > { %v1308_v52 = vpop.xlane.xlu0 %1307  ;;  %v1340_v37 = vadd.f32 %v1339_v45, %v1338_v44  ;;  %v1467_v35 = vadd.f32 %v1466_v25, %v1465_v4  ;;  %v1494_v29 = vadd.f32 %v1493_v10, %v1492_v8 }
 0x55e   : > { %v1309_v14 = vrot.slane %v1308_v52, 4 }
 0x560   : > { %v1310_v43 = vadd.f32 %v1309_v14, %v1308_v52 }
 0x561   : > { %v1353_v62 = vpop.xlane.xlu0 %1352 }
 0x562   : > { %v1311_v56 = vrot.slane %v1310_v43, 2  ;;  %v1354_v27 = vrot.slane %v1353_v62, 4 }
 0x564   : > { %v1355_v2 = vadd.f32 %v1354_v27, %v1353_v62  ;;  %v1312_v6 = vadd.f32 %v1311_v56, %v1310_v43 }
 0x565   : > { %v1476_v51 = vpop.xlane.xlu0 %1475 }
 0x566   : > { %v1356_v16 = vrot.slane %v1355_v2, 2  ;;  %v1477_v3 = vrot.slane %v1476_v51, 4  ;;  %v1313_v7 = vrot.slane %v1312_v6, 1 }
 0x568   : > { %v1478_v5 = vadd.f32 %v1477_v3, %v1476_v51  ;;  %v1314_v11 = vadd.f32 %v1313_v7, %v1312_v6  ;;  %v1357_v50 = vadd.f32 %v1356_v16, %v1355_v2 }
 0x569   : > { %v884_v54 = vpop.xlane.xlu0 %883 }
 0x56a   : > { %v1479_v33 = vrot.slane %v1478_v5, 2  ;;  %2016 = vlog2.f32 %v884_v54  ;;  %1848 = vpush %v1314_v11  ;;  %v1358_v0 = vrot.slane %v1357_v50, 1 }
 0x56b   : > { %1850 = vpush %v1340_v37 }
 0x56c   : > { %v1359_v63 = vadd.f32 %v1358_v0, %v1357_v50  ;;  %v1480_v49 = vadd.f32 %v1479_v33, %v1478_v5 }
 0x56d   : > { %v888_v23 = vpop.xlane.xlu0 %887 }
 0x56e   : > { %2018 = vlog2.f32 %v888_v23  ;;  %1852 = vpush %v1359_v63  ;;  %v1481_v58 = vrot.slane %v1480_v49, 1 }
 0x56f   : > { %1854 = vpush %v1467_v35 }
 0x570   : > { %v1482_v39 = vadd.f32 %v1481_v58, %v1480_v49 }
 0x571   : > { %v892_v19 = vpop.xlane.xlu0 %891 }
 0x572   : > { %2020 = vlog2.f32 %v892_v19  ;;  %1856 = vpush %v1482_v39 }
 0x573   : > { %1858 = vpush %v1494_v29 }
 0x574   : > { %v2017_v1 = vpop.eup %2016 }
 0x575   : > { %v916_v53 = vmul.f32 0.6931472, %v2017_v1  ;;  %v896_v28 = vpop.xlane.xlu0 %895 }
 0x576   : > { %2022 = vlog2.f32 %v896_v28 }
 0x577   : > { %v947_v22 = vsub.f32 %v2576_v59, %v916_v53 }
 0x578   : > { %v2019_v9 = vpop.eup %2018 }
 0x579   : > { %963 = vst [vmem:[%s2621_s14] sm:$0xff] %v947_v22  ;;  %v920_v34 = vmul.f32 0.6931472, %v2019_v9  ;;  %v900_v57 = vpop.xlane.xlu0 %899 }
 0x57a   : > { %2024 = vlog2.f32 %v900_v57 }
 0x57b   : > { %v949_v15 = vsub.f32 %v2581_v13, %v920_v34 }
 0x57c   : > { %v2021_v18 = vpop.eup %2020 }
 0x57d   : > { %965 = vst [vmem:[%s2621_s14 + $0x10] sm:$0xff] %v949_v15  ;;  %v924_v24 = vmul.f32 0.6931472, %v2021_v18  ;;  %v904_v20 = vpop.xlane.xlu0 %903 }
 0x57e   : > { %2026 = vlog2.f32 %v904_v20 }
 0x57f   : > { %v951_v48 = vsub.f32 %v2585_v30, %v924_v24 }
 0x580   : > { %v2023_v12 = vpop.eup %2022 }
 0x581   : > { %967 = vst [vmem:[%s2621_s14 + $0x20] sm:$0xff] %v951_v48  ;;  %v928_v59 = vmul.f32 0.6931472, %v2023_v12  ;;  %v908_v31 = vpop.xlane.xlu0 %907 }
 0x582   : > { %2028 = vlog2.f32 %v908_v31 }
 0x583   : > { %v953_v47 = vsub.f32 %v2591_v40, %v928_v59 }
 0x584   : > { %v2025_v36 = vpop.eup %2024 }
 0x585   : > { %969 = vst [vmem:[%s2621_s14 + $0x30] sm:$0xff] %v953_v47  ;;  %v932_v13 = vmul.f32 0.6931472, %v2025_v36  ;;  %v912_v61 = vpop.xlane.xlu0 %911 }
 0x586   : > { %2030 = vlog2.f32 %v912_v61 }
 0x587   : > { %v955_v38 = vsub.f32 %v2596_v41, %v932_v13 }
 0x588   : > { %v2027_v17 = vpop.eup %2026 }
 0x589   : > { %971 = vst [vmem:[%s2621_s14 + $0x40] sm:$0xff] %v955_v38  ;;  %v936_v30 = vmul.f32 0.6931472, %v2027_v17 }
 0x58b   : > { %v957_v52 = vsub.f32 %v2600_v42, %v936_v30 }
 0x58c   : > { %v2029_v14 = vpop.eup %2028 }
 0x58d   : > { %973 = vst [vmem:[%s2621_s14 + $0x50] sm:$0xff] %v957_v52  ;;  %v940_v32 = vmul.f32 0.6931472, %v2029_v14 }
 0x58f   : > { %v959_v43 = vsub.f32 %v2604_v60, %v940_v32 }
 0x590   : > { %v2031_v40 = vpop.eup %2030 }
 0x591   : > { %975 = vst [vmem:[%s2621_s14 + $0x60] sm:$0xff] %v959_v43  ;;  %v944_v46 = vmul.f32 0.6931472, %v2031_v40 }
 0x593   : > { %v961_v62 = vsub.f32 %v2608_v21, %v944_v46 }
 0x595   : > { %977 = vst [vmem:[%s2621_s14 + $0x70] sm:$0xff] %v961_v62 }
 0x59b   : > { %s1849_s15 = spop %1848 }
 0x59c   : > { %v1316_v44 = vstv %s1849_s15  ;;  %s1851_s16 = spop %1850 }
 0x59d   : > { %2032 = vrsqrt.f32 %v1316_v44  ;;  %v1342_v41 = vstv %s1851_s16  ;;  %vm1319_vm10 = vcmp.eq.f32.partialorder %v1316_v44, inf  ;;  %v1322_v11 = vand.u32 2147483648, %v1316_v44 }
 0x59e   : > { %2034 = vrsqrt.f32 %v1342_v41  ;;  %vm1345_vm8 = vcmp.eq.f32.partialorder %v1342_v41, inf  ;;  %v1348_v26 = vand.u32 2147483648, %v1342_v41  ;;  %vm1347_vm9 = vcmp.eq.f32.partialorder %v1342_v41, 0.0 }
 0x59f   : > { %s1853_s23 = spop %1852  ;;  %vm1321_vm11 = vcmp.eq.f32.partialorder %v1316_v44, 0.0 }
 0x5a0   : > { %v1361_v56 = vstv %s1853_s23  ;;  %s1855_s11 = spop %1854 }
 0x5a1   : > { %v1362_v42 = vmax.f32 %v1361_v56, 1.0  ;;  %v1469_v27 = vstv %s1855_s11 }
 0x5a2   : > { %v1470_v4 = vmax.f32 %v1469_v27, 1e-12 }
 0x5a3   : > { %2036 = vrcp.f32 %v1362_v42  ;;  %s1857_s30 = spop %1856 }
 0x5a4   : > { %2038 = vrcp.f32 %v1470_v4  ;;  %s1859_s14 = spop %1858  ;;  %v1484_v8 = vstv %s1857_s30 }
 0x5a5   : > { %v1496_v5 = vstv %s1859_s14 }
 0x5a7   : > { %v2033_v60 = vpop.eup %2032 }
 0x5a8   : > { %v2035_v2 = vpop.eup %2034  ;;  %v1318_v6 = vmul.f32 %v2033_v60, %v1316_v44 }
 0x5a9   : > { %v1344_v21 = vmul.f32 %v2035_v2, %v1342_v41 }
 0x5aa   : > { %v1320_v7 = vsel %vm1319_vm10, %v1316_v44, %v1318_v6 }
 0x5ab   : > { %v1346_v51 = vsel %vm1345_vm8, %v1342_v41, %v1344_v21  ;;  %v1323_v37 = vsel %vm1321_vm11, %v1322_v11, %v1320_v7 }
 0x5ac   : > { %v1349_v16 = vsel %vm1347_vm9, %v1348_v26, %v1346_v51  ;;  %v1368_v35 = vsel %vm1367_vm12, %v1323_v37, 0.0 }
 0x5ad   : > { %v2037_v45 = vpop.eup %2036 }
 0x5ae   : > { %v2039_v3 = vpop.eup %2038  ;;  %v1364_v25 = vmul.f32 %v2037_v45, %v1349_v16 }
 0x5af   : > { %v1498_v50 = vmul.f32 %v2039_v3, %v1496_v5 }
 0x5b0   : > { %v1365_v54 = vmul.f32 2.828427, %v1364_v25 }
 0x5b1   : > { %v1499_v0 = vsub.f32 %v1484_v8, %v1498_v50 }
 0x5b2   : > { %v1743_v33 = vadd.f32 -1.0, %v1365_v54 }
 0x5b3   : > { %v1500_v23 = vsub.f32 0.0, %v1499_v0 }
 0x5b4   : > { %v1370_v63 = vsel %vm1369_vm13, %v1743_v33, 0.0 }
 0x5b5   : > { %v1371_v49 = vadd.f32 %v1370_v63, %v1368_v35  ;;  %v1501_v10 = vmul.f32 %v2039_v3, %v1500_v23 }
 0x5b7   : > { %1372 = vst [vmem:[%s395_s26] sm:$0x1] %v1371_v49  ;;  %v1506_v39 = vsel %vm1505_vm14, %v1501_v10, 0.0 }
 0x5be   : > { %v1504_v58 = vld [vmem:[%s395_s26] sm:$0x1] }
 0x5bf   : > { %v1507_v19 = vadd.f32 %v1506_v39, %v1504_v58 }
 0x5c1   : > { %1508 = vst [vmem:[%s395_s26] sm:$0x1] %v1507_v19 }
 0x5c2 PF: > { %p1866_p4 = scmp.ge.s32.totalorder %s2118_s10, 2  ;;  %s1549_s20 = sand.u32 1, %s2098_s27  }
 0x5c3   : > { %s1550_s21 = scalar_lea.sflag [#allocation6], %s1549_s20 }
 0x5c4   : > { %p1863_p2 = pnand %p1866_p4, %p2216_p8 }
 0x5c6   : > { %2093 = dma.done.wait (!%p1863_p2), %s1550_s21, 128  }
 0x5c7   : > { %2095 = vsyncadd (!%p1863_p2), %s1550_s21, 4294967168  ;;  %s22_s10 = sadd.s32 1, %s2118_s10   ;;  %s2734_s27 = smov %s2102_s28 }
 0x5c8   : > { %p19_p3 = scmp.ge.s32.totalorder %s22_s10, 4   ;;  %s2735_s28 = smov %s2106_s29 }
 0x5c9   : > { %s2736_s29 = smov %s2222_s18  ;;  %s2737_s30 = smov %s2114_s9 }
 0x5ca   : > { %s2738_s9 = smov %s2740_s13  ;;  %21 = sbr.rel (!%p19_p3) target bundleno = 4 (0x4), region = 121 }
 0x5d1   :  { %1569 = vsyncpa [#allocation6], 1 }
 0x5d2   :  { %1571 = vsyncpa [#allocation6 + $0x1], 1 }

</bundles_post_ra>
